<compile_context>
chip_gen: v5e
topology: v5e:2x2
jax: 0.10.0
libtpu: 0.0.40
codegen_flags: <defaults>
</compile_context>

<pallas_src>
import functools

import jax
import jax.numpy as jnp
import numpy as np
from jax.experimental import pallas as pl
from jax.experimental.pallas import tpu as pltpu


def _round_up(n, m):
    return ((n + m - 1) // m) * m


# ----------------------------------------------------------------------------
# Fused decoder kernel body (built per static (batch, inner_grid_size, Bp)).
# ----------------------------------------------------------------------------
def _make_fused_kernel(batch, g, bp):
    f32 = jnp.float32
    bf16 = jnp.bfloat16

    def kernel(x_ref, w1_ref, w2_ref, w3_ref, u1_ref, bd2_ref, bd3_ref,
               bd4_ref, out_ref, t1_scr, t3_scr):
        o1 = pl.program_id(0)

        # ---- step 0 only: linears + up1 + up2 + up3 into persistent scratch.
        @pl.when(o1 == 0)
        def _prefix():
            # 3x (Linear no-bias + tanh); bf16 operands, f32 accumulation.
            h = jnp.tanh(jnp.dot(x_ref[...], w1_ref[...],
                                 preferred_element_type=f32)).astype(bf16)
            h = jnp.tanh(jnp.dot(h, w2_ref[...],
                                 preferred_element_type=f32)).astype(bf16)
            # w3 columns pre-permuted -> h is spatial-major / channels-last:
            # h[b, s*32 + c].
            h = jnp.tanh(jnp.dot(h, w3_ref[...],
                                 preferred_element_type=f32)).astype(bf16)

            # Zero so the (bp - batch) pad rows of every spatial slab stay 0.
            t1_scr[...] = jnp.zeros_like(t1_scr)

            # up1 (+tanh), one spatial site at a time: 128-lane full-width
            # stores at sublane-aligned row offsets s*bp (rows ordered (s,b)).
            for s in range(g ** 3):
                t1_s = jnp.tanh(jnp.dot(h[:, s * 32:(s + 1) * 32], u1_ref[...],
                                        preferred_element_type=f32))
                t1_scr[s * bp:s * bp + batch, :] = t1_s.astype(bf16)

            # up2 (+tanh), block-diagonal over o1: (Mp,128) @ (128,512).
            t2 = jnp.tanh(jnp.dot(t1_scr[...], bd2_ref[...],
                                  preferred_element_type=f32)).astype(bf16)

            # up3 (+tanh) per o1 block, written straight into lane-dense
            # (256-wide) scratch slabs -- no x8 row-expansion copy pass.
            for o in range(8):
                t3_scr[o] = jnp.tanh(
                    jnp.dot(t2[:, o * 64:(o + 1) * 64], bd3_ref[...],
                            preferred_element_type=f32)).astype(bf16)

        # ---- every step: up4 (no tanh) for this o1's output row block.
        # bd4 columns are pre-permuted to (ch, d_low, h_low, w_low), so this
        # is already the final column layout (lane-dense 1536 = 12*128), and
        # the Pallas pipeline overlaps this block's writeback with step o1+1.
        out_ref[...] = jnp.dot(t3_scr[o1], bd4_ref[...],
                               preferred_element_type=f32)

    return kernel


# ----------------------------------------------------------------------------
# Parameter construction / one-time weight preparation
# ----------------------------------------------------------------------------
def init_params(key, latent_dimension, out_grid_size):
    inner = int(out_grid_size * 2 ** (-4))
    hidden = 32 * inner ** 3
    ks = jax.random.split(key, 7)
    scale = 0.1
    params = {
        # Linear weights stored as (in, out) so forward is x @ w (bias=False).
        "w1": scale * jax.random.normal(ks[0], (latent_dimension, hidden), jnp.float32),
        "w2": scale * jax.random.normal(ks[1], (hidden, hidden), jnp.float32),
        "w3": scale * jax.random.normal(ks[2], (hidden, hidden), jnp.float32),
        # ConvTranspose3d weights in PyTorch layout (Cin, Cout, 2, 2, 2).
        "up1": scale * jax.random.normal(ks[3], (32, 16, 2, 2, 2), jnp.float32),
        "up2": scale * jax.random.normal(ks[4], (16, 8, 2, 2, 2), jnp.float32),
        "up3": scale * jax.random.normal(ks[5], (8, 4, 2, 2, 2), jnp.float32),
        "up4": scale * jax.random.normal(ks[6], (4, 3, 2, 2, 2), jnp.float32),
    }
    return params, inner


def _conv_weight_to_matmul(w):
    """(Cin, Cout, 2, 2, 2) -> (Cin, 8*Cout), columns ordered (kd, kh, kw, cout)."""
    cin = w.shape[0]
    cout = w.shape[1]
    return jnp.transpose(w, (0, 2, 3, 4, 1)).reshape(cin, 8 * cout)


def prepare_weights(params, inner):
    """One-time preparation of kernel-ready (composed, bf16) weights."""
    g = inner
    hidden = 32 * g ** 3
    # Column permutation so linear3's output is spatial-major / channels-last:
    # new column s*32 + c  <-  old column c*g^3 + s.
    perm = (np.arange(32)[None, :] * (g ** 3)
            + np.arange(g ** 3)[:, None]).reshape(-1)
    assert perm.shape[0] == hidden

    u1 = _conv_weight_to_matmul(params["up1"])            # (32, 128)
    u2 = _conv_weight_to_matmul(params["up2"])            # (16,  64)
    u3 = _conv_weight_to_matmul(params["up3"])            # ( 8,  32)
    u4 = _conv_weight_to_matmul(params["up4"])            # ( 4,  24)

    bd4 = jnp.kron(jnp.eye(64, dtype=jnp.float32), u4)    # (256, 1536)
    # Bake the old output column permutation into bd4: columns become
    # (ch, kd2, kd3, kd4, kh2, kh3, kh4, kw2, kw3, kw4) = (ch, d_low, h_low, w_low).
    bd4p = bd4.reshape(256, 2, 2, 2, 2, 2, 2, 2, 2, 2, 3)
    bd4p = jnp.transpose(bd4p, (0, 10, 1, 4, 7, 2, 5, 8, 3, 6, 9)).reshape(256, 1536)

    bf16 = jnp.bfloat16
    return {
        "w1": params["w1"].astype(bf16),
        "w2": params["w2"].astype(bf16),
        "w3p": params["w3"][:, perm].astype(bf16),
        "u1": u1.astype(bf16),
        "bd2": jnp.kron(jnp.eye(8, dtype=jnp.float32), u2).astype(bf16),   # (128, 512)
        "bd3": jnp.kron(jnp.eye(8, dtype=jnp.float32), u3).astype(bf16),   # ( 64, 256)
        "bd4p": bd4p.astype(bf16),                                         # (256, 1536)
    }


def _vmem_budget_bytes():
    """Per-generation VMEM budget: physical capacity minus compiler headroom."""
    cap = 64 * 1024 * 1024
    try:
        cap = int(pltpu.get_tpu_info().vmem_capacity_bytes)
    except Exception:
        pass
    headroom = 32 * 1024 * 1024 if cap > 96 * 1024 * 1024 else 8 * 1024 * 1024
    return cap - headroom


# ----------------------------------------------------------------------------
# Forward pass: one gridded pallas_call + a single NCDHW row interleave
# ----------------------------------------------------------------------------
@functools.partial(jax.jit, static_argnames=("inner",))
def deep_decoder3d_forward(x, prep, inner):
    g = inner
    B = x.shape[0]
    Bp = _round_up(B, 8)          # sublane-aligned rows per spatial site
    Mp = (g ** 3) * Bp            # padded rows per o1 output block

    budget = _vmem_budget_bytes()

    # Rough VMEM footprint: double-buffered inputs / output block + scratch +
    # step-0 live f32 temporaries.
    w_elems = sum(int(np.prod(prep[k].shape))
                  for k in ("w1", "w2", "w3p", "u1", "bd2", "bd3", "bd4p"))
    hidden = 32 * g ** 3
    est = (2 * 2 * (w_elems + x.size)               # bf16 inputs, x2 buffers
           + 2 * 4 * Mp * 1536                      # f32 output block, x2 buffers
           + 2 * (Mp * 128 + 8 * Mp * 256)          # bf16 scratch
           + 4 * (4 * B * hidden + 3 * Mp * 512))   # step-0 f32 temporaries
    if est > budget:
        # TODO(synk): add a K/N-tiled, HBM-streamed fallback (weights blocked
        # over the grid) for configs that exceed the per-generation VMEM
        # budget (e.g. out_grid_size >= 64 with large batch).
        raise NotImplementedError(
            "fused DeepDecoder3d kernel would exceed the VMEM budget "
            f"(~{int(est) >> 20} MiB needed, {budget >> 20} MiB available)")

    kernel = _make_fused_kernel(B, g, Bp)
    grid_spec = pltpu.PrefetchScalarGridSpec(
        num_scalar_prefetch=0,
        grid=(8,),                                   # one step per up1 offset o1
        in_specs=[
            pl.BlockSpec(x.shape, lambda o1: (0, 0)),
            pl.BlockSpec(prep["w1"].shape, lambda o1: (0, 0)),
            pl.BlockSpec(prep["w2"].shape, lambda o1: (0, 0)),
            pl.BlockSpec(prep["w3p"].shape, lambda o1: (0, 0)),
            pl.BlockSpec(prep["u1"].shape, lambda o1: (0, 0)),
            pl.BlockSpec(prep["bd2"].shape, lambda o1: (0, 0)),
            pl.BlockSpec(prep["bd3"].shape, lambda o1: (0, 0)),
            pl.BlockSpec(prep["bd4p"].shape, lambda o1: (0, 0)),
        ],
        out_specs=pl.BlockSpec((Mp, 1536), lambda o1: (o1, 0)),
        scratch_shapes=[
            pltpu.VMEM((Mp, 128), jnp.bfloat16),      # t1 (up1 output)
            pltpu.VMEM((8, Mp, 256), jnp.bfloat16),   # t3 (up3 output), per o1
        ],
    )
    out2d = pl.pallas_call(
        kernel,
        out_shape=jax.ShapeDtypeStruct((8 * Mp, 1536), jnp.float32),
        grid_spec=grid_spec,
        compiler_params=pltpu.CompilerParams(
            dimension_semantics=("arbitrary",),
            vmem_limit_bytes=int(budget)),
    )(x.astype(jnp.bfloat16), prep["w1"], prep["w2"], prep["w3p"],
      prep["u1"], prep["bd2"], prep["bd3"], prep["bd4p"])

    # ---- single scatter back to NCDHW (B, 3, 16g, 16g, 16g). ---------------
    # Columns are already (ch, d_low, h_low, w_low); drop the batch-pad rows
    # and interleave rows (kd1, kh1, kw1, i, j, k, b) into full D/H/W coords.
    y = out2d.reshape(8, g ** 3, Bp, 3, 8, 8, 8)[:, :, :B]
    y = y.reshape(2, 2, 2, g, g, g, B, 3, 8, 8, 8)
    y = jnp.transpose(y, (6, 7, 3, 0, 8, 4, 1, 9, 5, 2, 10))
    return y.reshape(B, 3, 16 * g, 16 * g, 16 * g)


# ----------------------------------------------------------------------------
# Pure-JAX f32 reference (mirrors the PyTorch module) for numerical checks
# ----------------------------------------------------------------------------
def _ref_conv_transpose(x, w, apply_tanh):
    B, _, g, _, _ = x.shape
    Cout = w.shape[1]
    y = jnp.einsum("bcijk,coxyz->boixjykz", x, w)
    y = y.reshape(B, Cout, 2 * g, 2 * g, 2 * g)
    return jnp.tanh(y) if apply_tanh else y


def _ref_forward(x, params, inner):
    B = x.shape[0]
    h = jnp.tanh(x @ params["w1"])
    h = jnp.tanh(h @ params["w2"])
    h = jnp.tanh(h @ params["w3"]).reshape(B, 32, inner, inner, inner)
    h = _ref_conv_transpose(h, params["up1"], True)
    h = _ref_conv_transpose(h, params["up2"], True)
    h = _ref_conv_transpose(h, params["up3"], True)
    h = _ref_conv_transpose(h, params["up4"], False)
    return h


def _check(latent_dimension, out_grid_size, batch):
    key = jax.random.PRNGKey(0)
    pkey, xkey = jax.random.split(key)
    params, inner = init_params(pkey, latent_dimension, out_grid_size)
    prep = prepare_weights(params, inner)
    x = jax.random.normal(xkey, (batch, latent_dimension), jnp.float32)

    out = jax.block_until_ready(deep_decoder3d_forward(x, prep, inner))
    assert out.shape == (batch, 3, out_grid_size, out_grid_size, out_grid_size)

    ref = jax.block_until_ready(_ref_forward(x, params, inner))
    # bf16 MXU operands (f32 accumulation) -> tolerances loosened vs f32 ref.
    np.testing.assert_allclose(np.asarray(out), np.asarray(ref),
                               rtol=5e-2, atol=5e-3)


if __name__ == "__main__":
    # inner_grid_size = 1 (smallest config) and inner_grid_size = 2, which
    # exercises the g > 1 layout path (w3 column permutation, per-site row
    # slabs, batch padding) that the review flagged as untested.
    _check(latent_dimension=8, out_grid_size=16, batch=2)
    _check(latent_dimension=8, out_grid_size=32, batch=3)
    print("KERNEL_OK")
</pallas_src>

<mosaic_0001>
module attributes {stable_mosaic.version = 11 : i64} {
  func.func @kernel(%arg0: i32, %arg1: memref<2x8xbf16, #tpu.memory_space<vmem>>, %arg2: memref<8x32xbf16, #tpu.memory_space<vmem>>, %arg3: memref<32x32xbf16, #tpu.memory_space<vmem>>, %arg4: memref<32x32xbf16, #tpu.memory_space<vmem>>, %arg5: memref<32x128xbf16, #tpu.memory_space<vmem>>, %arg6: memref<128x512xbf16, #tpu.memory_space<vmem>>, %arg7: memref<64x256xbf16, #tpu.memory_space<vmem>>, %arg8: memref<256x1536xbf16, #tpu.memory_space<vmem>>, %arg9: memref<8x1536xf32, #tpu.memory_space<vmem>>, %arg10: memref<8x128xbf16, #tpu.memory_space<vmem>>, %arg11: memref<8x8x256xbf16, #tpu.memory_space<vmem>>) attributes {dimension_semantics = [#tpu.dimension_semantics<arbitrary>], iteration_bounds = array<i64: 8>, scalar_prefetch = 0 : i64, scratch_operands = 2 : i64, tpu.core_type = #tpu.core_type<tc>, window_params = [{pipeline_mode = #tpu.pipeline_mode<synchronous>, transform_indices = @transform_0, window_bounds = array<i64: 2, 8>}, {pipeline_mode = #tpu.pipeline_mode<synchronous>, transform_indices = @transform_1, window_bounds = array<i64: 8, 32>}, {pipeline_mode = #tpu.pipeline_mode<synchronous>, transform_indices = @transform_2, window_bounds = array<i64: 32, 32>}, {pipeline_mode = #tpu.pipeline_mode<synchronous>, transform_indices = @transform_3, window_bounds = array<i64: 32, 32>}, {pipeline_mode = #tpu.pipeline_mode<synchronous>, transform_indices = @transform_4, window_bounds = array<i64: 32, 128>}, {pipeline_mode = #tpu.pipeline_mode<synchronous>, transform_indices = @transform_5, window_bounds = array<i64: 128, 512>}, {pipeline_mode = #tpu.pipeline_mode<synchronous>, transform_indices = @transform_6, window_bounds = array<i64: 64, 256>}, {pipeline_mode = #tpu.pipeline_mode<synchronous>, transform_indices = @transform_7, window_bounds = array<i64: 256, 1536>}, {transform_indices = @transform_8, window_bounds = array<i64: 8, 1536>}]} {
    %c0_i32 = arith.constant 0 : i32
    %0 = arith.cmpi eq, %arg0, %c0_i32 : i32
    %1 = arith.extui %0 : i1 to i32
    %c0_i32_0 = arith.constant 0 : i32
    %2 = arith.cmpi ne, %1, %c0_i32_0 : i32
    scf.if %2 {
      %c0_6 = arith.constant 0 : index
      %c0_7 = arith.constant 0 : index
      %9 = vector.load %arg1[%c0_6, %c0_7] : memref<2x8xbf16, #tpu.memory_space<vmem>>, vector<2x8xbf16>
      %c0_8 = arith.constant 0 : index
      %c0_9 = arith.constant 0 : index
      %10 = vector.load %arg2[%c0_8, %c0_9] : memref<8x32xbf16, #tpu.memory_space<vmem>>, vector<8x32xbf16>
      %cst_10 = arith.constant dense<0.000000e+00> : vector<2x32xf32>
      %11 = tpu.matmul %9, %10, %cst_10 {dimension_numbers = #tpu.dot_dimension_numbers<[1], [0], [0], [1], [0, 0, 1, 1], [], []>} : vector<2x8xbf16>, vector<8x32xbf16>, vector<2x32xf32> -> vector<2x32xf32>
      %12 = math.tanh %11 : vector<2x32xf32>
      %13 = arith.truncf %12 : vector<2x32xf32> to vector<2x32xbf16>
      %c0_11 = arith.constant 0 : index
      %c0_12 = arith.constant 0 : index
      %14 = vector.load %arg3[%c0_11, %c0_12] : memref<32x32xbf16, #tpu.memory_space<vmem>>, vector<32x32xbf16>
      %cst_13 = arith.constant dense<0.000000e+00> : vector<2x32xf32>
      %15 = tpu.matmul %13, %14, %cst_13 {dimension_numbers = #tpu.dot_dimension_numbers<[1], [0], [0], [1], [0, 0, 1, 1], [], []>} : vector<2x32xbf16>, vector<32x32xbf16>, vector<2x32xf32> -> vector<2x32xf32>
      %16 = math.tanh %15 : vector<2x32xf32>
      %17 = arith.truncf %16 : vector<2x32xf32> to vector<2x32xbf16>
      %c0_14 = arith.constant 0 : index
      %c0_15 = arith.constant 0 : index
      %18 = vector.load %arg4[%c0_14, %c0_15] : memref<32x32xbf16, #tpu.memory_space<vmem>>, vector<32x32xbf16>
      %cst_16 = arith.constant dense<0.000000e+00> : vector<2x32xf32>
      %19 = tpu.matmul %17, %18, %cst_16 {dimension_numbers = #tpu.dot_dimension_numbers<[1], [0], [0], [1], [0, 0, 1, 1], [], []>} : vector<2x32xbf16>, vector<32x32xbf16>, vector<2x32xf32> -> vector<2x32xf32>
      %20 = math.tanh %19 : vector<2x32xf32>
      %21 = arith.truncf %20 : vector<2x32xf32> to vector<2x32xbf16>
      %cst_17 = arith.constant 0.000000e+00 : bf16
      %22 = vector.broadcast %cst_17 : bf16 to vector<8x128xbf16>
      %c0_18 = arith.constant 0 : index
      %c0_19 = arith.constant 0 : index
      %23 = vector.load %arg10[%c0_18, %c0_19] : memref<8x128xbf16, #tpu.memory_space<vmem>>, vector<8x128xbf16>
      tpu.vector_store %arg10[%c0_18, %c0_19], %22 {strides = array<i32>} : memref<8x128xbf16, #tpu.memory_space<vmem>>, vector<8x128xbf16>,
      %c0_20 = arith.constant 0 : index
      %c0_21 = arith.constant 0 : index
      %24 = vector.load %arg5[%c0_20, %c0_21] : memref<32x128xbf16, #tpu.memory_space<vmem>>, vector<32x128xbf16>
      %cst_22 = arith.constant dense<0.000000e+00> : vector<2x128xf32>
      %25 = tpu.matmul %21, %24, %cst_22 {dimension_numbers = #tpu.dot_dimension_numbers<[1], [0], [0], [1], [0, 0, 1, 1], [], []>} : vector<2x32xbf16>, vector<32x128xbf16>, vector<2x128xf32> -> vector<2x128xf32>
      %26 = math.tanh %25 : vector<2x128xf32>
      %27 = arith.truncf %26 : vector<2x128xf32> to vector<2x128xbf16>
      %c0_23 = arith.constant 0 : index
      %c0_24 = arith.constant 0 : index
      %28 = vector.load %arg10[%c0_23, %c0_24] : memref<8x128xbf16, #tpu.memory_space<vmem>>, vector<2x128xbf16>
      tpu.vector_store %arg10[%c0_23, %c0_24], %27 {strides = array<i32>} : memref<8x128xbf16, #tpu.memory_space<vmem>>, vector<2x128xbf16>,
      %c0_25 = arith.constant 0 : index
      %c0_26 = arith.constant 0 : index
      %29 = vector.load %arg10[%c0_25, %c0_26] : memref<8x128xbf16, #tpu.memory_space<vmem>>, vector<8x128xbf16>
      %c0_27 = arith.constant 0 : index
      %c0_28 = arith.constant 0 : index
      %30 = vector.load %arg6[%c0_27, %c0_28] : memref<128x512xbf16, #tpu.memory_space<vmem>>, vector<128x512xbf16>
      %cst_29 = arith.constant dense<0.000000e+00> : vector<8x512xf32>
      %31 = tpu.matmul %29, %30, %cst_29 {dimension_numbers = #tpu.dot_dimension_numbers<[1], [0], [0], [1], [0, 0, 1, 1], [], []>} : vector<8x128xbf16>, vector<128x512xbf16>, vector<8x512xf32> -> vector<8x512xf32>
      %32 = math.tanh %31 : vector<8x512xf32>
      %33 = arith.truncf %32 : vector<8x512xf32> to vector<8x512xbf16>
      %34 = vector.extract_strided_slice %33 {offsets = [0, 0], sizes = [8, 64], strides = [1, 1]} : vector<8x512xbf16> to vector<8x64xbf16>
      %c0_30 = arith.constant 0 : index
      %c0_31 = arith.constant 0 : index
      %35 = vector.load %arg7[%c0_30, %c0_31] : memref<64x256xbf16, #tpu.memory_space<vmem>>, vector<64x256xbf16>
      %cst_32 = arith.constant dense<0.000000e+00> : vector<8x256xf32>
      %36 = tpu.matmul %34, %35, %cst_32 {dimension_numbers = #tpu.dot_dimension_numbers<[1], [0], [0], [1], [0, 0, 1, 1], [], []>} : vector<8x64xbf16>, vector<64x256xbf16>, vector<8x256xf32> -> vector<8x256xf32>
      %37 = math.tanh %36 : vector<8x256xf32>
      %38 = arith.truncf %37 : vector<8x256xf32> to vector<8x256xbf16>
      %c0_33 = arith.constant 0 : index
      %c0_34 = arith.constant 0 : index
      %c0_35 = arith.constant 0 : index
      %39 = vector.load %arg11[%c0_33, %c0_34, %c0_35] : memref<8x8x256xbf16, #tpu.memory_space<vmem>>, vector<1x8x256xbf16>
      %40 = vector.shape_cast %39 : vector<1x8x256xbf16> to vector<8x256xbf16>
      %41 = vector.shape_cast %38 : vector<8x256xbf16> to vector<1x8x256xbf16>
      tpu.vector_store %arg11[%c0_33, %c0_34, %c0_35], %41 {strides = array<i32>} : memref<8x8x256xbf16, #tpu.memory_space<vmem>>, vector<1x8x256xbf16>,
      %42 = vector.extract_strided_slice %33 {offsets = [0, 64], sizes = [8, 64], strides = [1, 1]} : vector<8x512xbf16> to vector<8x64xbf16>
      %c0_36 = arith.constant 0 : index
      %c0_37 = arith.constant 0 : index
      %43 = vector.load %arg7[%c0_36, %c0_37] : memref<64x256xbf16, #tpu.memory_space<vmem>>, vector<64x256xbf16>
      %cst_38 = arith.constant dense<0.000000e+00> : vector<8x256xf32>
      %44 = tpu.matmul %42, %43, %cst_38 {dimension_numbers = #tpu.dot_dimension_numbers<[1], [0], [0], [1], [0, 0, 1, 1], [], []>} : vector<8x64xbf16>, vector<64x256xbf16>, vector<8x256xf32> -> vector<8x256xf32>
      %45 = math.tanh %44 : vector<8x256xf32>
      %46 = arith.truncf %45 : vector<8x256xf32> to vector<8x256xbf16>
      %c1 = arith.constant 1 : index
      %c0_39 = arith.constant 0 : index
      %c0_40 = arith.constant 0 : index
      %47 = vector.load %arg11[%c1, %c0_39, %c0_40] : memref<8x8x256xbf16, #tpu.memory_space<vmem>>, vector<1x8x256xbf16>
      %48 = vector.shape_cast %47 : vector<1x8x256xbf16> to vector<8x256xbf16>
      %49 = vector.shape_cast %46 : vector<8x256xbf16> to vector<1x8x256xbf16>
      tpu.vector_store %arg11[%c1, %c0_39, %c0_40], %49 {strides = array<i32>} : memref<8x8x256xbf16, #tpu.memory_space<vmem>>, vector<1x8x256xbf16>,
      %50 = vector.extract_strided_slice %33 {offsets = [0, 128], sizes = [8, 64], strides = [1, 1]} : vector<8x512xbf16> to vector<8x64xbf16>
      %c0_41 = arith.constant 0 : index
      %c0_42 = arith.constant 0 : index
      %51 = vector.load %arg7[%c0_41, %c0_42] : memref<64x256xbf16, #tpu.memory_space<vmem>>, vector<64x256xbf16>
      %cst_43 = arith.constant dense<0.000000e+00> : vector<8x256xf32>
      %52 = tpu.matmul %50, %51, %cst_43 {dimension_numbers = #tpu.dot_dimension_numbers<[1], [0], [0], [1], [0, 0, 1, 1], [], []>} : vector<8x64xbf16>, vector<64x256xbf16>, vector<8x256xf32> -> vector<8x256xf32>
      %53 = math.tanh %52 : vector<8x256xf32>
      %54 = arith.truncf %53 : vector<8x256xf32> to vector<8x256xbf16>
      %c2 = arith.constant 2 : index
      %c0_44 = arith.constant 0 : index
      %c0_45 = arith.constant 0 : index
      %55 = vector.load %arg11[%c2, %c0_44, %c0_45] : memref<8x8x256xbf16, #tpu.memory_space<vmem>>, vector<1x8x256xbf16>
      %56 = vector.shape_cast %55 : vector<1x8x256xbf16> to vector<8x256xbf16>
      %57 = vector.shape_cast %54 : vector<8x256xbf16> to vector<1x8x256xbf16>
      tpu.vector_store %arg11[%c2, %c0_44, %c0_45], %57 {strides = array<i32>} : memref<8x8x256xbf16, #tpu.memory_space<vmem>>, vector<1x8x256xbf16>,
      %58 = vector.extract_strided_slice %33 {offsets = [0, 192], sizes = [8, 64], strides = [1, 1]} : vector<8x512xbf16> to vector<8x64xbf16>
      %c0_46 = arith.constant 0 : index
      %c0_47 = arith.constant 0 : index
      %59 = vector.load %arg7[%c0_46, %c0_47] : memref<64x256xbf16, #tpu.memory_space<vmem>>, vector<64x256xbf16>
      %cst_48 = arith.constant dense<0.000000e+00> : vector<8x256xf32>
      %60 = tpu.matmul %58, %59, %cst_48 {dimension_numbers = #tpu.dot_dimension_numbers<[1], [0], [0], [1], [0, 0, 1, 1], [], []>} : vector<8x64xbf16>, vector<64x256xbf16>, vector<8x256xf32> -> vector<8x256xf32>
      %61 = math.tanh %60 : vector<8x256xf32>
      %62 = arith.truncf %61 : vector<8x256xf32> to vector<8x256xbf16>
      %c3 = arith.constant 3 : index
      %c0_49 = arith.constant 0 : index
      %c0_50 = arith.constant 0 : index
      %63 = vector.load %arg11[%c3, %c0_49, %c0_50] : memref<8x8x256xbf16, #tpu.memory_space<vmem>>, vector<1x8x256xbf16>
      %64 = vector.shape_cast %63 : vector<1x8x256xbf16> to vector<8x256xbf16>
      %65 = vector.shape_cast %62 : vector<8x256xbf16> to vector<1x8x256xbf16>
      tpu.vector_store %arg11[%c3, %c0_49, %c0_50], %65 {strides = array<i32>} : memref<8x8x256xbf16, #tpu.memory_space<vmem>>, vector<1x8x256xbf16>,
      %66 = vector.extract_strided_slice %33 {offsets = [0, 256], sizes = [8, 64], strides = [1, 1]} : vector<8x512xbf16> to vector<8x64xbf16>
      %c0_51 = arith.constant 0 : index
      %c0_52 = arith.constant 0 : index
      %67 = vector.load %arg7[%c0_51, %c0_52] : memref<64x256xbf16, #tpu.memory_space<vmem>>, vector<64x256xbf16>
      %cst_53 = arith.constant dense<0.000000e+00> : vector<8x256xf32>
      %68 = tpu.matmul %66, %67, %cst_53 {dimension_numbers = #tpu.dot_dimension_numbers<[1], [0], [0], [1], [0, 0, 1, 1], [], []>} : vector<8x64xbf16>, vector<64x256xbf16>, vector<8x256xf32> -> vector<8x256xf32>
      %69 = math.tanh %68 : vector<8x256xf32>
      %70 = arith.truncf %69 : vector<8x256xf32> to vector<8x256xbf16>
      %c4 = arith.constant 4 : index
      %c0_54 = arith.constant 0 : index
      %c0_55 = arith.constant 0 : index
      %71 = vector.load %arg11[%c4, %c0_54, %c0_55] : memref<8x8x256xbf16, #tpu.memory_space<vmem>>, vector<1x8x256xbf16>
      %72 = vector.shape_cast %71 : vector<1x8x256xbf16> to vector<8x256xbf16>
      %73 = vector.shape_cast %70 : vector<8x256xbf16> to vector<1x8x256xbf16>
      tpu.vector_store %arg11[%c4, %c0_54, %c0_55], %73 {strides = array<i32>} : memref<8x8x256xbf16, #tpu.memory_space<vmem>>, vector<1x8x256xbf16>,
      %74 = vector.extract_strided_slice %33 {offsets = [0, 320], sizes = [8, 64], strides = [1, 1]} : vector<8x512xbf16> to vector<8x64xbf16>
      %c0_56 = arith.constant 0 : index
      %c0_57 = arith.constant 0 : index
      %75 = vector.load %arg7[%c0_56, %c0_57] : memref<64x256xbf16, #tpu.memory_space<vmem>>, vector<64x256xbf16>
      %cst_58 = arith.constant dense<0.000000e+00> : vector<8x256xf32>
      %76 = tpu.matmul %74, %75, %cst_58 {dimension_numbers = #tpu.dot_dimension_numbers<[1], [0], [0], [1], [0, 0, 1, 1], [], []>} : vector<8x64xbf16>, vector<64x256xbf16>, vector<8x256xf32> -> vector<8x256xf32>
      %77 = math.tanh %76 : vector<8x256xf32>
      %78 = arith.truncf %77 : vector<8x256xf32> to vector<8x256xbf16>
      %c5 = arith.constant 5 : index
      %c0_59 = arith.constant 0 : index
      %c0_60 = arith.constant 0 : index
      %79 = vector.load %arg11[%c5, %c0_59, %c0_60] : memref<8x8x256xbf16, #tpu.memory_space<vmem>>, vector<1x8x256xbf16>
      %80 = vector.shape_cast %79 : vector<1x8x256xbf16> to vector<8x256xbf16>
      %81 = vector.shape_cast %78 : vector<8x256xbf16> to vector<1x8x256xbf16>
      tpu.vector_store %arg11[%c5, %c0_59, %c0_60], %81 {strides = array<i32>} : memref<8x8x256xbf16, #tpu.memory_space<vmem>>, vector<1x8x256xbf16>,
      %82 = vector.extract_strided_slice %33 {offsets = [0, 384], sizes = [8, 64], strides = [1, 1]} : vector<8x512xbf16> to vector<8x64xbf16>
      %c0_61 = arith.constant 0 : index
      %c0_62 = arith.constant 0 : index
      %83 = vector.load %arg7[%c0_61, %c0_62] : memref<64x256xbf16, #tpu.memory_space<vmem>>, vector<64x256xbf16>
      %cst_63 = arith.constant dense<0.000000e+00> : vector<8x256xf32>
      %84 = tpu.matmul %82, %83, %cst_63 {dimension_numbers = #tpu.dot_dimension_numbers<[1], [0], [0], [1], [0, 0, 1, 1], [], []>} : vector<8x64xbf16>, vector<64x256xbf16>, vector<8x256xf32> -> vector<8x256xf32>
      %85 = math.tanh %84 : vector<8x256xf32>
      %86 = arith.truncf %85 : vector<8x256xf32> to vector<8x256xbf16>
      %c6 = arith.constant 6 : index
      %c0_64 = arith.constant 0 : index
      %c0_65 = arith.constant 0 : index
      %87 = vector.load %arg11[%c6, %c0_64, %c0_65] : memref<8x8x256xbf16, #tpu.memory_space<vmem>>, vector<1x8x256xbf16>
      %88 = vector.shape_cast %87 : vector<1x8x256xbf16> to vector<8x256xbf16>
      %89 = vector.shape_cast %86 : vector<8x256xbf16> to vector<1x8x256xbf16>
      tpu.vector_store %arg11[%c6, %c0_64, %c0_65], %89 {strides = array<i32>} : memref<8x8x256xbf16, #tpu.memory_space<vmem>>, vector<1x8x256xbf16>,
      %90 = vector.extract_strided_slice %33 {offsets = [0, 448], sizes = [8, 64], strides = [1, 1]} : vector<8x512xbf16> to vector<8x64xbf16>
      %c0_66 = arith.constant 0 : index
      %c0_67 = arith.constant 0 : index
      %91 = vector.load %arg7[%c0_66, %c0_67] : memref<64x256xbf16, #tpu.memory_space<vmem>>, vector<64x256xbf16>
      %cst_68 = arith.constant dense<0.000000e+00> : vector<8x256xf32>
      %92 = tpu.matmul %90, %91, %cst_68 {dimension_numbers = #tpu.dot_dimension_numbers<[1], [0], [0], [1], [0, 0, 1, 1], [], []>} : vector<8x64xbf16>, vector<64x256xbf16>, vector<8x256xf32> -> vector<8x256xf32>
      %93 = math.tanh %92 : vector<8x256xf32>
      %94 = arith.truncf %93 : vector<8x256xf32> to vector<8x256xbf16>
      %c7 = arith.constant 7 : index
      %c0_69 = arith.constant 0 : index
      %c0_70 = arith.constant 0 : index
      %95 = vector.load %arg11[%c7, %c0_69, %c0_70] : memref<8x8x256xbf16, #tpu.memory_space<vmem>>, vector<1x8x256xbf16>
      %96 = vector.shape_cast %95 : vector<1x8x256xbf16> to vector<8x256xbf16>
      %97 = vector.shape_cast %94 : vector<8x256xbf16> to vector<1x8x256xbf16>
      tpu.vector_store %arg11[%c7, %c0_69, %c0_70], %97 {strides = array<i32>} : memref<8x8x256xbf16, #tpu.memory_space<vmem>>, vector<1x8x256xbf16>,
    } else {
    }
    %3 = arith.index_cast %arg0 : i32 to index
    %c0 = arith.constant 0 : index
    %c0_1 = arith.constant 0 : index
    %4 = vector.load %arg11[%3, %c0, %c0_1] : memref<8x8x256xbf16, #tpu.memory_space<vmem>>, vector<1x8x256xbf16>
    %5 = vector.shape_cast %4 : vector<1x8x256xbf16> to vector<8x256xbf16>
    %c0_2 = arith.constant 0 : index
    %c0_3 = arith.constant 0 : index
    %6 = vector.load %arg8[%c0_2, %c0_3] : memref<256x1536xbf16, #tpu.memory_space<vmem>>, vector<256x1536xbf16>
    %cst = arith.constant dense<0.000000e+00> : vector<8x1536xf32>
    %7 = tpu.matmul %5, %6, %cst {dimension_numbers = #tpu.dot_dimension_numbers<[1], [0], [0], [1], [0, 0, 1, 1], [], []>} : vector<8x256xbf16>, vector<256x1536xbf16>, vector<8x1536xf32> -> vector<8x1536xf32>
    %c0_4 = arith.constant 0 : index
    %c0_5 = arith.constant 0 : index
    %8 = vector.load %arg9[%c0_4, %c0_5] : memref<8x1536xf32, #tpu.memory_space<vmem>>, vector<8x1536xf32>
    tpu.vector_store %arg9[%c0_4, %c0_5], %7 {strides = array<i32>} : memref<8x1536xf32, #tpu.memory_space<vmem>>, vector<8x1536xf32>,
    return
  }
  func.func @transform_0(%arg0: i32) -> (i32, i32) {
    %c0_i32 = arith.constant 0 : i32
    %c0_i32_0 = arith.constant 0 : i32
    %c0_i32_1 = arith.constant 0 : i32
    return %c0_i32, %c0_i32_0 : i32, i32
  }
  func.func @transform_1(%arg0: i32) -> (i32, i32) {
    %c0_i32 = arith.constant 0 : i32
    %c0_i32_0 = arith.constant 0 : i32
    %c0_i32_1 = arith.constant 0 : i32
    return %c0_i32, %c0_i32_0 : i32, i32
  }
  func.func @transform_2(%arg0: i32) -> (i32, i32) {
    %c0_i32 = arith.constant 0 : i32
    %c0_i32_0 = arith.constant 0 : i32
    %c0_i32_1 = arith.constant 0 : i32
    return %c0_i32, %c0_i32_0 : i32, i32
  }
  func.func @transform_3(%arg0: i32) -> (i32, i32) {
    %c0_i32 = arith.constant 0 : i32
    %c0_i32_0 = arith.constant 0 : i32
    %c0_i32_1 = arith.constant 0 : i32
    return %c0_i32, %c0_i32_0 : i32, i32
  }
  func.func @transform_4(%arg0: i32) -> (i32, i32) {
    %c0_i32 = arith.constant 0 : i32
    %c0_i32_0 = arith.constant 0 : i32
    %c0_i32_1 = arith.constant 0 : i32
    return %c0_i32, %c0_i32_0 : i32, i32
  }
  func.func @transform_5(%arg0: i32) -> (i32, i32) {
    %c0_i32 = arith.constant 0 : i32
    %c0_i32_0 = arith.constant 0 : i32
    %c0_i32_1 = arith.constant 0 : i32
    return %c0_i32, %c0_i32_0 : i32, i32
  }
  func.func @transform_6(%arg0: i32) -> (i32, i32) {
    %c0_i32 = arith.constant 0 : i32
    %c0_i32_0 = arith.constant 0 : i32
    %c0_i32_1 = arith.constant 0 : i32
    return %c0_i32, %c0_i32_0 : i32, i32
  }
  func.func @transform_7(%arg0: i32) -> (i32, i32) {
    %c0_i32 = arith.constant 0 : i32
    %c0_i32_0 = arith.constant 0 : i32
    %c0_i32_1 = arith.constant 0 : i32
    return %c0_i32, %c0_i32_0 : i32, i32
  }
  func.func @transform_8(%arg0: i32) -> (i32, i32) {
    %c0_i32 = arith.constant 0 : i32
    %c0_i32_0 = arith.constant 0 : i32
    return %arg0, %c0_i32 : i32, i32
  }
}

</mosaic_0001>

<bundles_post_ra>
// kernel: deep_decoder3d_forward.1
= control target key start
LH: loop header
LB: loop body
LE: loop exit
PB: predicated region body
PF: predicated region fallthrough
CT: control target
= control target key end

     0   :  { %13 = vsyncpa [#allocation5], 0  ;;  %s5172_s0 = inlined_call_operand.vmem [shape: bf16[2,8], index: 0, kind: input, shape index: {}]   ;;  %s5173_s1 = inlined_call_operand.hbm [shape: bf16[8,32], index: 1, kind: input, shape index: {}]   ;;  %s5174_s2 = inlined_call_operand.hbm [shape: bf16[32,32], index: 2, kind: input, shape index: {}]   ;;  %s5175_s3 = inlined_call_operand.hbm [shape: bf16[32,32], index: 3, kind: input, shape index: {}]   ;;  %s5176_s4 = inlined_call_operand.hbm [shape: bf16[32,128], index: 4, kind: input, shape index: {}]   ;;  %s5177_s5 = inlined_call_operand.hbm [shape: bf16[128,512], index: 5, kind: input, shape index: {}]   ;;  %s5178_s6 = inlined_call_operand.hbm [shape: bf16[64,256], index: 6, kind: input, shape index: {}]   ;;  %s5179_s7 = inlined_call_operand.hbm [shape: bf16[256,1536], index: 7, kind: input, shape index: {}]   ;;  %s5180_s8 = inlined_call_operand.vmem [shape: f32[64,1536], index: 8, kind: output, shape index: {}]  }
   0x1   :  { %14 = vsyncpa [#allocation7], 0 }
   0x2   :  { %15 = vsyncpa [#allocation10], 0 }
   0x3   :  { %16 = vsyncpa [#allocation13], 0  ;;  %s5010_s27 = smov 0  }
   0x4 LB: > { %s247_s30 = sshll.u32 %s5174_s2, 4  ;;  %s5019_s9 = sadd.s32 4294967295, %s4946_s27   ;;  %s4946_s27 = sphi %s5010_s27, %s22_s27   ;;  %s248_s30 = int_to_ptr.hbm [resolvable:$true] %s247_s30 }
   0x5   : > { %p3063_p0 = scmp.ge.s32.totalorder %s4946_s27, 1  ;;  %p221_p1 = scmp.lt.s32.totalorder %s4946_s27, 9 }
   0x6   : > { %p3064_p2 = scmp.ne.s32.totalorder %s5019_s9, 0  ;;  %p4627_p3 = scmp.eq.s32.totalorder %s5019_s9, 0 }
   0x7   : > { %p5025_p4 = pnand %p3063_p0, %p221_p1  ;;  %s4948_s11 = smov [#allocation6]  }
   0x8   : > { %s249_s12 = sshll.u32 %s4948_s11, 4  ;;  %s275_s15 = sshll.u32 %s5176_s4, 4  ;;  %s250_s12 = int_to_ptr.vmem [resolvable:$true] %s249_s12  ;;  %s276_s15 = int_to_ptr.hbm [resolvable:$true] %s275_s15 }
   0x9   : > { %p4605_p5 = pneg %p5025_p4  ;;  %s4949_s17 = smov [#allocation9]  }
   0xa   : > { %s277_s18 = sshll.u32 %s4949_s17, 4  ;;  %s303_s21 = sshll.u32 %s5178_s6, 4  ;;  %s278_s18 = int_to_ptr.vmem [resolvable:$true] %s277_s18  ;;  %s304_s21 = int_to_ptr.hbm [resolvable:$true] %s303_s21 }
   0xb   : > { %p5036_p6 = pnand %p4627_p3, %p4605_p5  ;;  %s4950_s22 = smov 64  }
   0xc   : > { %s4951_s23 = smov 4   ;;  %s4952_s24 = smov [#allocation12]  }
   0xd   : > { %4611 = dma.hbm_to_vmem [thread:$0]  (!%p5036_p6), %s248_s30, 256, %s250_s12, [#allocation7], %s4950_s22, %s4950_s22, %s4951_s23  }
   0xe   : > { %4617 = dma.hbm_to_vmem [thread:$0]  (!%p5036_p6), %s276_s15, 256, %s278_s18, [#allocation10], %s4950_s22, %s4950_s22, %s4951_s23  }
   0xf   : > { %s305_s25 = sshll.u32 %s4952_s24, 4  ;;  %s4953_s26 = smov 128   ;;  %s306_s25 = int_to_ptr.vmem [resolvable:$true] %s305_s25 }
  0x10   : > { %s4954_s28 = smov 8   ;;  %s236_s13 = sshll.u32 %s5173_s1, 4  ;;  %s237_s13 = int_to_ptr.hbm [resolvable:$true] %s236_s13 }
  0x11   : > { %4623 = dma.hbm_to_vmem [thread:$0]  (!%p5036_p6), %s304_s21, 1024, %s306_s25, [#allocation13], %s4953_s26, %s4953_s26, %s4954_s28  }
  0x12   : > { %s4955_s14 = smov [#allocation4]   ;;  %s261_s15 = sshll.u32 %s5175_s3, 4  ;;  %s262_s15 = int_to_ptr.hbm [resolvable:$true] %s261_s15 }
  0x13   : > { %s238_s17 = sshll.u32 %s4955_s14, 4  ;;  %s4956_s18 = smov [#allocation8]   ;;  %s239_s17 = int_to_ptr.vmem [resolvable:$true] %s238_s17 }
  0x14   : > { %4608 = dma.hbm_to_vmem [thread:$0]  (!%p5036_p6), %s237_s13, 64, %s239_s17, [#allocation5]  }
  0x15   : > { %s263_s19 = sshll.u32 %s4956_s18, 4  ;;  %s289_s24 = sshll.u32 %s5177_s5, 4  ;;  %s264_s19 = int_to_ptr.vmem [resolvable:$true] %s263_s19  ;;  %s290_s24 = int_to_ptr.hbm [resolvable:$true] %s289_s24 }
  0x16   : > { %4614 = dma.hbm_to_vmem [thread:$0]  (!%p5036_p6), %s262_s15, 256, %s264_s19, [#allocation7], %s4950_s22, %s4950_s22, %s4951_s23  }
  0x17   : > { %s4957_s25 = smov [#allocation11]   ;;  %s317_s11 = sshll.u32 %s5179_s7, 4  ;;  %s318_s11 = int_to_ptr.hbm [resolvable:$true] %s317_s11 }
  0x18   : > { %s291_s26 = sshll.u32 %s4957_s25, 4  ;;  %s4958_s13 = smov 256   ;;  %s292_s26 = int_to_ptr.vmem [resolvable:$true] %s291_s26 }
  0x19   : > { %s4959_s14 = smov 16   ;;  %s4960_s17 = smov [#allocation14]  }
  0x1a   : > { %4620 = dma.hbm_to_vmem [thread:$0]  (!%p5036_p6), %s290_s24, 4096, %s292_s26, [#allocation10], %s4958_s13, %s4958_s13, %s4959_s14  }
  0x1b   : > { %s319_s30 = sshll.u32 %s4960_s17, 4  ;;  %s4961_s12 = smov 768   ;;  %s320_s30 = int_to_ptr.vmem [resolvable:$true] %s319_s30 }
  0x1c   : > { %s4962_s18 = smov 48   ;;  %335 = sbr.rel (%p5025_p4) target bundleno = 1395 (0x573), region = 52 }
  0x1d   : > { %4626 = dma.hbm_to_vmem [thread:$0]  (!%p5036_p6), %s318_s11, 24576, %s320_s30, [#allocation13], %s4961_s12, %s4961_s12, %s4962_s18  }
  0x21   : > { %4929 = dma.done.wait (%p4627_p3), [#allocation5], 64  }
  0x22   : > { %4931 = vsyncadd (%p4627_p3), [#allocation5], 4294967232 }
  0x23   : > { %4933 = dma.done.wait (%p4627_p3), [#allocation7], 512  }
  0x24   : > { %4935 = vsyncadd (%p4627_p3), [#allocation7], 4294966784 }
  0x25   : > { %4937 = dma.done.wait (%p4627_p3), [#allocation10], 4352  }
  0x26   : > { %4939 = vsyncadd (%p4627_p3), [#allocation10], 4294962944 }
  0x27   : > { %4941 = dma.done.wait (%p4627_p3), [#allocation13], 25600  }
  0x28   : > { %4943 = vsyncadd (%p4627_p3), [#allocation13], 4294941696  ;;  %p395_p7 = scmp.lt.s32.totalorder %s5019_s9, 7  ;;  %s4964_s21 = smov (!%p3064_p2), 64  }
  0x2a   : > { %s396_s10 = scalar_select %p395_p7, %s5019_s9, 7 }
  0x2b   : > { %404 = sbr.rel (%p3064_p2) target bundleno = 1059 (0x423), region = 84 }
  0x2c   : > { %s4576_s16 = smul.u32 96, %s396_s10 }
  0x2e   : > { %s5092_s15 = scalar_lea.vmem %s5180_s8, %s4576_s16 }
  0x30   : > { %v406_v0 = vld [vmem:[#allocation4] sm:$0xf]  ;;  %vm411_vm0 = vcmask 1043456   ;;  %v405_v2 = vld [vmem:[%s5172_s0] sm:$0x1]  ;;  %vm407_vm1 = vcmask 64512  }
  0x31   : > { %v413_v1 = vsel %vm411_vm0, %v406_v0, 0  ;;  %v4282_v3 = vld [vmem:[#allocation6 + $0x8] sm:$0xff]  ;;  %v4281_v4 = vld [vmem:[#allocation6] sm:$0xff]  ;;  %vm446_vm2 = vcmask 261120   ;;  %v4284_v9 = vld [vmem:[#allocation8 + $0x8] sm:$0xff]  ;;  %v4963_v62 = vmov 0  }
  0x32   : > { %422 = vmatpush.bf16.msra.mxu0 %v413_v1  ;;  %456 = vmatpush.bf16.msra.mxu1 %v4282_v3  ;;  %v4283_v10 = vld [vmem:[#allocation8] sm:$0xff]  ;;  %v4286_v15 = vld [vmem:[#allocation9 + $0x8] sm:$0xff]  ;;  %v4285_v16 = vld [vmem:[#allocation9] sm:$0xff]  ;;  %499 = vst [vmem:[#allocation2] sm:$0xf] %v4963_v62  ;;  %vm834_vm3 = vcmask 523264  }
  0x33   : > { %490 = vmatpush.bf16.msra.mxu2 %v4284_v9  ;;  %525 = vmatpush.bf16.msra.mxu3 %v4286_v15  ;;  %v3223_v17 = vld [vmem:[#allocation11 + $0xe0] sm:$0xf]  ;;  %v4317_v18 = vld [vmem:[#allocation11 + $0xec] sm:$0xf0]  ;;  %v4315_v19 = vld [vmem:[#allocation11 + $0xe4] sm:$0xf] }
  0x34   : > { %v3224_v20 = vor.u32 %v4317_v18, %v3223_v17  ;;  %v3225_v21 = vld [vmem:[#allocation11 + $0xf0] sm:$0xf0]  ;;  %v3231_v22 = vld [vmem:[#allocation11 + $0xe8] sm:$0xf]  ;;  %v4318_v23 = vld [vmem:[#allocation11 + $0xf4] sm:$0xf0] }
  0x35   : > { %3081 = vmatmul.msk.bf16.vlgmr.msra.gmra.mxu0 %vm407_vm1, %v405_v2  ;;  %v3228_v24 = vor.u32 %v4315_v19, %v3225_v21  ;;  %v3232_v25 = vor.u32 %v4318_v23, %v3231_v22  ;;  %v4316_v26 = vld [vmem:[#allocation11 + $0xec] sm:$0xf]  ;;  %v3233_v27 = vld [vmem:[#allocation11 + $0xf8] sm:$0xf0]  ;;  %v3207_v28 = vld [vmem:[#allocation11 + $0xc0] sm:$0xf] }
  0x36   : > { %457 = vmatpush.bf16.msra.mxu1 %v4281_v4  ;;  %728 = vmatpush.bf16.msrb.mxu0 %v3224_v20  ;;  %v3236_v29 = vor.u32 %v4316_v26, %v3233_v27  ;;  %v4313_v30 = vld [vmem:[#allocation11 + $0xcc] sm:$0xf0]  ;;  %v4311_v31 = vld [vmem:[#allocation11 + $0xc4] sm:$0xf]  ;;  %v3209_v32 = vld [vmem:[#allocation11 + $0xd0] sm:$0xf0] }
  0x37   : > { %491 = vmatpush.bf16.msra.mxu2 %v4283_v10  ;;  %526 = vmatpush.bf16.msra.mxu3 %v4285_v16  ;;  %v3208_v33 = vor.u32 %v4313_v30, %v3207_v28  ;;  %v3212_v34 = vor.u32 %v4311_v31, %v3209_v32  ;;  %v3215_v35 = vld [vmem:[#allocation11 + $0xc8] sm:$0xf]  ;;  %v4314_v36 = vld [vmem:[#allocation11 + $0xd4] sm:$0xf0]  ;;  %v4312_v37 = vld [vmem:[#allocation11 + $0xcc] sm:$0xf] }
  0x38   : > { %v3216_v38 = vor.u32 %v4314_v36, %v3215_v35  ;;  %v3217_v39 = vld [vmem:[#allocation11 + $0xd8] sm:$0xf0]  ;;  %v3191_v40 = vld [vmem:[#allocation11 + $0xa0] sm:$0xf]  ;;  %v4309_v41 = vld [vmem:[#allocation11 + $0xac] sm:$0xf0] }
  0x39   : > { %v3220_v42 = vor.u32 %v4312_v37, %v3217_v39  ;;  %v4307_v43 = vld [vmem:[#allocation11 + $0xa4] sm:$0xf]  ;;  %v3193_v44 = vld [vmem:[#allocation11 + $0xb0] sm:$0xf0]  ;;  %v3199_v45 = vld [vmem:[#allocation11 + $0xa8] sm:$0xf]  ;;  %v3192_v46 = vor.u32 %v4309_v41, %v3191_v40 }
  0x3a   : > { %741 = vmatpush.bf16.msrb.mxu1 %v3228_v24  ;;  %729 = vmatpush.bf16.msrb.mxu0 %v3208_v33  ;;  %v4310_v47 = vld [vmem:[#allocation11 + $0xb4] sm:$0xf0]  ;;  %v4308_v48 = vld [vmem:[#allocation11 + $0xac] sm:$0xf]  ;;  %v3201_v49 = vld [vmem:[#allocation11 + $0xb8] sm:$0xf0]  ;;  %v3196_v50 = vor.u32 %v4307_v43, %v3193_v44 }
  0x3b   : > { %754 = vmatpush.bf16.msrb.mxu2 %v3232_v25  ;;  %767 = vmatpush.bf16.msrb.mxu3 %v3236_v29  ;;  %v3200_v51 = vor.u32 %v4310_v47, %v3199_v45  ;;  %v3175_v52 = vld [vmem:[#allocation11 + $0x80] sm:$0xf]  ;;  %v4305_v53 = vld [vmem:[#allocation11 + $0x8c] sm:$0xf0]  ;;  %v4303_v54 = vld [vmem:[#allocation11 + $0x84] sm:$0xf]  ;;  %v3204_v55 = vor.u32 %v4308_v48, %v3201_v49 }
  0x3c   : > { %v3177_v56 = vld [vmem:[#allocation11 + $0x90] sm:$0xf0]  ;;  %v3183_v57 = vld [vmem:[#allocation11 + $0x88] sm:$0xf]  ;;  %v4306_v58 = vld [vmem:[#allocation11 + $0x94] sm:$0xf0]  ;;  %v3176_v61 = vor.u32 %v4305_v53, %v3175_v52 }
  0x3d   : > { %v4304_v59 = vld [vmem:[#allocation11 + $0x8c] sm:$0xf]  ;;  %v3185_v60 = vld [vmem:[#allocation11 + $0x98] sm:$0xf0]  ;;  %v3180_v63 = vor.u32 %v4303_v54, %v3177_v56  ;;  %v3184_v0 = vor.u32 %v4306_v58, %v3183_v57  ;;  %v3161_v10 = vld [vmem:[#allocation11 + $0x70] sm:$0xf0] }
  0x3e   : > { %742 = vmatpush.bf16.msrb.mxu1 %v3212_v34  ;;  %730 = vmatpush.bf16.msrb.mxu0 %v3192_v46  ;;  %v3188_v1 = vor.u32 %v4304_v59, %v3185_v60  ;;  %v4300_v15 = vld [vmem:[#allocation11 + $0x6c] sm:$0xf]  ;;  %v3169_v16 = vld [vmem:[#allocation11 + $0x78] sm:$0xf0]  ;;  %v3143_v18 = vld [vmem:[#allocation11 + $0x40] sm:$0xf] }
  0x3f   : > { %755 = vmatpush.bf16.msrb.mxu2 %v3216_v38  ;;  %768 = vmatpush.bf16.msrb.mxu3 %v3220_v42  ;;  %v3172_v17 = vor.u32 %v4300_v15, %v3169_v16  ;;  %v4297_v19 = vld [vmem:[#allocation11 + $0x4c] sm:$0xf0]  ;;  %v4295_v20 = vld [vmem:[#allocation11 + $0x44] sm:$0xf]  ;;  %v3145_v22 = vld [vmem:[#allocation11 + $0x50] sm:$0xf0] }
  0x40   : > { %v3144_v21 = vor.u32 %v4297_v19, %v3143_v18  ;;  %v3151_v23 = vld [vmem:[#allocation11 + $0x48] sm:$0xf]  ;;  %v4298_v24 = vld [vmem:[#allocation11 + $0x54] sm:$0xf0]  ;;  %v3148_v25 = vor.u32 %v4295_v20, %v3145_v22  ;;  %v4296_v27 = vld [vmem:[#allocation11 + $0x4c] sm:$0xf] }
  0x41   : > { %v3152_v26 = vor.u32 %v4298_v24, %v3151_v23  ;;  %v3153_v28 = vld [vmem:[#allocation11 + $0x58] sm:$0xf0]  ;;  %v3127_v30 = vld [vmem:[#allocation11 + $0x20] sm:$0xf]  ;;  %v4293_v31 = vld [vmem:[#allocation11 + $0x2c] sm:$0xf0] }
  0x42   : > { %743 = vmatpush.bf16.msrb.mxu1 %v3196_v50  ;;  %731 = vmatpush.bf16.msrb.mxu0 %v3176_v61  ;;  %v3156_v29 = vor.u32 %v4296_v27, %v3153_v28  ;;  %v4291_v32 = vld [vmem:[#allocation11 + $0x24] sm:$0xf]  ;;  %v3128_v33 = vor.u32 %v4293_v31, %v3127_v30  ;;  %v3129_v34 = vld [vmem:[#allocation11 + $0x30] sm:$0xf0]  ;;  %v3135_v35 = vld [vmem:[#allocation11 + $0x28] sm:$0xf] }
  0x43   : > { %756 = vmatpush.bf16.msrb.mxu2 %v3200_v51  ;;  %769 = vmatpush.bf16.msrb.mxu3 %v3204_v55  ;;  %v4294_v36 = vld [vmem:[#allocation11 + $0x34] sm:$0xf0]  ;;  %v3132_v37 = vor.u32 %v4291_v32, %v3129_v34  ;;  %v4292_v39 = vld [vmem:[#allocation11 + $0x2c] sm:$0xf]  ;;  %v3137_v40 = vld [vmem:[#allocation11 + $0x38] sm:$0xf0] }
  0x44   : > { %v3136_v38 = vor.u32 %v4294_v36, %v3135_v35  ;;  %v3111_v41 = vld [vmem:[#allocation11] sm:$0xf]  ;;  %v3140_v42 = vor.u32 %v4292_v39, %v3137_v40  ;;  %v4289_v43 = vld [vmem:[#allocation11 + $0xc] sm:$0xf0]  ;;  %v4287_v44 = vld [vmem:[#allocation11 + $0x4] sm:$0xf] }
  0x45   : > { %v3113_v45 = vld [vmem:[#allocation11 + $0x10] sm:$0xf0]  ;;  %v3112_v46 = vor.u32 %v4289_v43, %v3111_v41  ;;  %v3119_v48 = vld [vmem:[#allocation11 + $0x8] sm:$0xf]  ;;  %v4290_v49 = vld [vmem:[#allocation11 + $0x14] sm:$0xf0] }
  0x46   : > { %744 = vmatpush.bf16.msrb.mxu1 %v3180_v63  ;;  %v3116_v47 = vor.u32 %v4287_v44, %v3113_v45  ;;  %v4288_v50 = vld [vmem:[#allocation11 + $0xc] sm:$0xf]  ;;  %v3120_v51 = vor.u32 %v4290_v49, %v3119_v48  ;;  %v3121_v52 = vld [vmem:[#allocation11 + $0x18] sm:$0xf0]  ;;  %v3263_v54 = vld [vmem:[#allocation12 + $0x30] sm:$0xf] }
  0x47   : > { %757 = vmatpush.bf16.msrb.mxu2 %v3184_v0  ;;  %770 = vmatpush.bf16.msrb.mxu3 %v3188_v1  ;;  %v3124_v53 = vor.u32 %v4288_v50, %v3121_v52  ;;  %v4326_v55 = vld [vmem:[#allocation12 + $0x34] sm:$0xf0]  ;;  %v4325_v56 = vld [vmem:[#allocation12 + $0x34] sm:$0xf]  ;;  %v3265_v58 = vld [vmem:[#allocation12 + $0x38] sm:$0xf0] }
  0x48   : > { %v3264_v57 = vor.u32 %v4326_v55, %v3263_v54  ;;  %v3255_v59 = vld [vmem:[#allocation12 + $0x20] sm:$0xf]  ;;  %v4324_v60 = vld [vmem:[#allocation12 + $0x24] sm:$0xf0]  ;;  %v3268_v61 = vor.u32 %v4325_v56, %v3265_v58  ;;  %v4323_v62 = vld [vmem:[#allocation12 + $0x24] sm:$0xf] }
  0x49   : > { %v3257_v63 = vld [vmem:[#allocation12 + $0x28] sm:$0xf0]  ;;  %v3256_v0 = vor.u32 %v4324_v60, %v3255_v59  ;;  %v4319_v15 = vld [vmem:[#allocation12 + $0x4] sm:$0xf]  ;;  %v3331_v19 = vld [vmem:[#allocation12 + $0x30] sm:$0xf] }
  0x4a   : > { %v3260_v1 = vor.u32 %v4323_v62, %v3257_v63  ;;  %v4342_v20 = vld [vmem:[#allocation12 + $0x34] sm:$0xf0]  ;;  %v3333_v23 = vld [vmem:[#allocation12 + $0x38] sm:$0xf0]  ;;  %v4339_v27 = vld [vmem:[#allocation12 + $0x24] sm:$0xf] }
  0x4b   : > { %771 = vmatpush.bf16.msrb.mxu3 %v3172_v17  ;;  %v3241_v17 = vld [vmem:[#allocation12 + $0x8] sm:$0xf0]  ;;  %v3332_v22 = vor.u32 %v4342_v20, %v3331_v19  ;;  %v3315_v31 = vld [vmem:[#allocation12 + $0x10] sm:$0xf]  ;;  %v4338_v32 = vld [vmem:[#allocation12 + $0x14] sm:$0xf0] }
  0x4c   : > { %v3244_v18 = vor.u32 %v4319_v15, %v3241_v17  ;;  %v3316_v34 = vor.u32 %v4338_v32, %v3315_v31  ;;  %v3317_v35 = vld [vmem:[#allocation12 + $0x18] sm:$0xf0]  ;;  %v4335_v39 = vld [vmem:[#allocation12 + $0x4] sm:$0xf]  ;;  %v3309_v41 = vld [vmem:[#allocation12 + $0x8] sm:$0xf0] }
  0x4d   : > { %v3399_v45 = vld [vmem:[#allocation12 + $0x30] sm:$0xf]  ;;  %v3401_v48 = vld [vmem:[#allocation12 + $0x38] sm:$0xf0]  ;;  %v4356_v59 = vld [vmem:[#allocation12 + $0x24] sm:$0xf0] }
  0x4e   : > { %v4355_v60 = vld [vmem:[#allocation12 + $0x24] sm:$0xf]  ;;  %v4352_v15 = vld [vmem:[#allocation12 + $0x4] sm:$0xf0]  ;;  %v3377_v17 = vld [vmem:[#allocation12 + $0x8] sm:$0xf0] }
  0x4f   : > { %772 = vmatpush.bf16.msrb.mxu3 %v3156_v29  ;;  %v3325_v29 = vld [vmem:[#allocation12 + $0x28] sm:$0xf0]  ;;  %v4372_v31 = vld [vmem:[#allocation12 + $0x24] sm:$0xf0]  ;;  %v4371_v32 = vld [vmem:[#allocation12 + $0x24] sm:$0xf] }
  0x50   : > { %v3328_v30 = vor.u32 %v4339_v27, %v3325_v29 }
  0x53   : > { %773 = vmatpush.bf16.msrb.mxu3 %v3140_v42  ;;  %v3312_v42 = vor.u32 %v4335_v39, %v3309_v41  ;;  %v4334_v39 = vld [vmem:[#allocation12 + $0x34] sm:$0xf0] }
  0x57   : > { %774 = vmatpush.bf16.msrb.mxu3 %v3124_v53 }
  0xb2   : > { %v424_v5 = vpop.f32.mrf.mxu0 }
  0xb3   : > { %4666 = vtanh.f32 %v424_v5 }
  0xb9   : > { %v4667_v6 = vpop.eup %4666 }
  0xba   : > { %v429_v7 = vpack.c.bf16 %v4667_v6, %v4667_v6  ;;  %v426_v8 = vpop.f32.mrf.mxu0  ;;  %v3159_v6 = vld [vmem:[#allocation11 + $0x60] sm:$0xf] }
  0xbb   : > { %v4299_v8 = vld [vmem:[#allocation11 + $0x64] sm:$0xf] }
  0xbc   : > { %3090 = vmatmul.msk.bf16.vlgmr.msra.gmra.mxu1 %vm446_vm2, %v429_v7  ;;  %v4301_v7 = vld [vmem:[#allocation11 + $0x6c] sm:$0xf0] }
  0xbd   : > { %v3160_v9 = vor.u32 %v4301_v7, %v3159_v6  ;;  %v3247_v7 = vld [vmem:[#allocation12 + $0x10] sm:$0xf] }
  0xbf   : > { %732 = vmatpush.bf16.msrb.mxu0 %v3160_v9  ;;  %v4321_v9 = vld [vmem:[#allocation12 + $0x14] sm:$0xf] }
  0xc3   : > { %733 = vmatpush.bf16.msrb.mxu0 %v3144_v21  ;;  %v4341_v21 = vld [vmem:[#allocation12 + $0x34] sm:$0xf] }
  0xc4   : > { %v3336_v24 = vor.u32 %v4341_v21, %v3333_v23 }
  0xc7   : > { %734 = vmatpush.bf16.msrb.mxu0 %v3128_v33  ;;  %v4337_v33 = vld [vmem:[#allocation12 + $0x14] sm:$0xf] }
  0xc8   : > { %v3320_v36 = vor.u32 %v4337_v33, %v3317_v35  ;;  %v3461_v33 = vld [vmem:[#allocation12 + $0x28] sm:$0xf0]  ;;  %v3451_v35 = vld [vmem:[#allocation12 + $0x10] sm:$0xf] }
  0xcb   : > { %735 = vmatpush.bf16.msrb.mxu0 %v3112_v46  ;;  %v4358_v46 = vld [vmem:[#allocation12 + $0x34] sm:$0xf0] }
  0xcc   : > { %v3400_v55 = vor.u32 %v4358_v46, %v3399_v45  ;;  %v3289_v45 = vld [vmem:[#allocation12 + $0x20] sm:$0xf]  ;;  %v4332_v46 = vld [vmem:[#allocation12 + $0x24] sm:$0xf0] }
  0xcf   : > { %842 = vmatpush.bf16.msra.mxu0 %v3264_v57  ;;  %v3391_v57 = vld [vmem:[#allocation12 + $0x20] sm:$0xf] }
  0xd0   : > { %v3392_v63 = vor.u32 %v4356_v59, %v3391_v57  ;;  %v3443_v57 = vld [vmem:[#allocation12] sm:$0xf]  ;;  %v3283_v59 = vld [vmem:[#allocation12 + $0x18] sm:$0xf0] }
  0xd3   : > { %843 = vmatpush.bf16.msra.mxu0 %v3256_v0 }
 0x139   : > { %v459_v11 = vpop.f32.mrf.mxu1 }
 0x13a   : > { %4668 = vtanh.f32 %v459_v11  ;;  %v3167_v11 = vld [vmem:[#allocation11 + $0x68] sm:$0xf] }
 0x140   : > { %v4669_v12 = vpop.eup %4668 }
 0x141   : > { %v464_v13 = vpack.c.bf16 %v4669_v12, %v4669_v12  ;;  %v461_v14 = vpop.f32.mrf.mxu1  ;;  %v4302_v12 = vld [vmem:[#allocation11 + $0x74] sm:$0xf0] }
 0x142   : > { %v3168_v14 = vor.u32 %v4302_v12, %v3167_v11  ;;  %v3249_v11 = vld [vmem:[#allocation12 + $0x18] sm:$0xf0] }
 0x143   : > { %3099 = vmatmul.msk.bf16.vlgmr.msra.gmra.mxu2 %vm446_vm2, %v464_v13  ;;  %v3164_v13 = vor.u32 %v4299_v8, %v3161_v10  ;;  %v4322_v8 = vld [vmem:[#allocation12 + $0x14] sm:$0xf0]  ;;  %v3252_v12 = vor.u32 %v4321_v9, %v3249_v11 }
 0x144   : > { %758 = vmatpush.bf16.msrb.mxu2 %v3168_v14  ;;  %v3248_v10 = vor.u32 %v4322_v8, %v3247_v7  ;;  %v4320_v14 = vld [vmem:[#allocation12 + $0x4] sm:$0xf0] }
 0x145   : > { %745 = vmatpush.bf16.msrb.mxu1 %v3164_v13  ;;  %v3239_v13 = vld [vmem:[#allocation12] sm:$0xf] }
 0x146   : > { %844 = vmatpush.bf16.msra.mxu0 %v3248_v10  ;;  %v3240_v16 = vor.u32 %v4320_v14, %v3239_v13  ;;  %v3375_v13 = vld [vmem:[#allocation12] sm:$0xf] }
 0x147   : > { %v3376_v20 = vor.u32 %v4352_v15, %v3375_v13  ;;  %v3357_v15 = vld [vmem:[#allocation12 + $0x20] sm:$0xf] }
 0x148   : > { %759 = vmatpush.bf16.msrb.mxu2 %v3152_v26  ;;  %v4340_v26 = vld [vmem:[#allocation12 + $0x24] sm:$0xf0] }
 0x149   : > { %746 = vmatpush.bf16.msrb.mxu1 %v3148_v25  ;;  %v3323_v25 = vld [vmem:[#allocation12 + $0x20] sm:$0xf] }
 0x14a   : > { %845 = vmatpush.bf16.msra.mxu0 %v3240_v16  ;;  %v3324_v28 = vor.u32 %v4340_v26, %v3323_v25  ;;  %v4351_v16 = vld [vmem:[#allocation12 + $0x4] sm:$0xf]  ;;  %v4373_v25 = vld [vmem:[#allocation12 + $0x34] sm:$0xf]  ;;  %v3469_v26 = vld [vmem:[#allocation12 + $0x38] sm:$0xf0] }
 0x14b   : > { %v3380_v21 = vor.u32 %v4351_v16, %v3377_v17  ;;  %v3472_v29 = vor.u32 %v4373_v25, %v3469_v26  ;;  %v4348_v16 = vld [vmem:[#allocation12 + $0x24] sm:$0xf0]  ;;  %v3351_v25 = vld [vmem:[#allocation12 + $0x18] sm:$0xf0] }
 0x14c   : > { %760 = vmatpush.bf16.msrb.mxu2 %v3136_v38  ;;  %v4336_v38 = vld [vmem:[#allocation12 + $0x4] sm:$0xf0] }
 0x14d   : > { %747 = vmatpush.bf16.msrb.mxu1 %v3132_v37  ;;  %v3307_v37 = vld [vmem:[#allocation12] sm:$0xf] }
 0x14e   : > { %v3308_v40 = vor.u32 %v4336_v38, %v3307_v37  ;;  %v4369_v37 = vld [vmem:[#allocation12 + $0x14] sm:$0xf]  ;;  %v3297_v38 = vld [vmem:[#allocation12 + $0x30] sm:$0xf] }
 0x150   : > { %761 = vmatpush.bf16.msrb.mxu2 %v3120_v51 }
 0x151   : > { %748 = vmatpush.bf16.msrb.mxu1 %v3116_v47  ;;  %v4357_v47 = vld [vmem:[#allocation12 + $0x34] sm:$0xf] }
 0x152   : > { %v3404_v56 = vor.u32 %v4357_v47, %v3401_v48  ;;  %v3453_v47 = vld [vmem:[#allocation12 + $0x18] sm:$0xf0] }
 0x155   : > { %855 = vmatpush.bf16.msra.mxu1 %v3268_v61  ;;  %v3393_v61 = vld [vmem:[#allocation12 + $0x28] sm:$0xf0] }
 0x156   : > { %v3396_v0 = vor.u32 %v4355_v60, %v3393_v61  ;;  %v4368_v60 = vld [vmem:[#allocation12 + $0x4] sm:$0xf0]  ;;  %v4367_v61 = vld [vmem:[#allocation12 + $0x4] sm:$0xf] }
 0x159   : > { %856 = vmatpush.bf16.msra.mxu1 %v3260_v1  ;;  %v3383_v1 = vld [vmem:[#allocation12 + $0x10] sm:$0xf] }
 0x15d   : > { %857 = vmatpush.bf16.msra.mxu1 %v3252_v12 }
 0x161   : > { %858 = vmatpush.bf16.msra.mxu1 %v3244_v18 }
 0x1c6   : > { %v493_v2 = vpop.f32.mrf.mxu2 }
 0x1c7   : > { %4670 = vtanh.f32 %v493_v2 }
 0x1cd   : > { %v4671_v3 = vpop.eup %4670 }
 0x1ce   : > { %v498_v4 = vpack.c.bf16 %v4671_v3, %v4671_v3  ;;  %v495_v5 = vpop.f32.mrf.mxu2 }
 0x1d0   : > { %3108 = vmatmul.msk.bf16.vlgmr.msra.gmra.mxu3 %vm446_vm2, %v498_v4 }
 0x253   : > { %v528_v2 = vpop.f32.mrf.mxu3 }
 0x254   : > { %4672 = vtanh.f32 %v528_v2 }
 0x25a   : > { %v4673_v3 = vpop.eup %4672 }
 0x25b   : > { %v533_v4 = vpack.c.bf16 %v4673_v3, %v4673_v3  ;;  %v530_v5 = vpop.f32.mrf.mxu3  ;;  %v4354_v3 = vld [vmem:[#allocation12 + $0x14] sm:$0xf0] }
 0x25c   : > { %v3385_v5 = vld [vmem:[#allocation12 + $0x18] sm:$0xf0]  ;;  %v3384_v11 = vor.u32 %v4354_v3, %v3383_v1  ;;  %v3273_v1 = vld [vmem:[#allocation12] sm:$0xf]  ;;  %v3444_v3 = vor.u32 %v4368_v60, %v3443_v57  ;;  %v3501_v60 = vld [vmem:[#allocation12 + $0x30] sm:$0xf] }
 0x25d   : > { %534 = vst [vmem:[#allocation2] sm:$0x1] %v533_v4  ;;  %v4353_v4 = vld [vmem:[#allocation12 + $0x14] sm:$0xf] }
 0x25e   : > { %v3388_v12 = vor.u32 %v4353_v4, %v3385_v5  ;;  %v4327_v5 = vld [vmem:[#allocation12 + $0x4] sm:$0xf] }
 0x264   : > { %v535_v6 = vld [vmem:[#allocation2] sm:$0xf] }
 0x265   : > { %736 = vmatmul.bf16.vlgmr.msrb.gmra.mxu0 %v535_v6  ;;  %749 = vmatmul.bf16.vlgmr.msrb.gmra.mxu1 %v535_v6 }
 0x266   : > { %762 = vmatmul.bf16.vlgmr.msrb.gmra.mxu2 %v535_v6  ;;  %775 = vmatmul.bf16.vlgmr.msrb.gmra.mxu3 %v535_v6 }
 0x267   : > { %1012 = vmatpush.bf16.msrb.mxu0 %v3332_v22  ;;  %1025 = vmatpush.bf16.msrb.mxu1 %v3336_v24  ;;  %v3467_v22 = vld [vmem:[#allocation12 + $0x30] sm:$0xf]  ;;  %v4374_v24 = vld [vmem:[#allocation12 + $0x34] sm:$0xf0] }
 0x26b   : > { %1013 = vmatpush.bf16.msrb.mxu0 %v3324_v28  ;;  %1026 = vmatpush.bf16.msrb.mxu1 %v3328_v30  ;;  %v3468_v28 = vor.u32 %v4374_v24, %v3467_v22  ;;  %v3459_v30 = vld [vmem:[#allocation12 + $0x20] sm:$0xf]  ;;  %v4346_v22 = vld [vmem:[#allocation12 + $0x14] sm:$0xf0] }
 0x26f   : > { %1014 = vmatpush.bf16.msrb.mxu0 %v3316_v34  ;;  %1027 = vmatpush.bf16.msrb.mxu1 %v3320_v36  ;;  %v3460_v34 = vor.u32 %v4372_v31, %v3459_v30  ;;  %v4370_v36 = vld [vmem:[#allocation12 + $0x14] sm:$0xf0]  ;;  %v3343_v31 = vld [vmem:[#allocation12 + $0x8] sm:$0xf0] }
 0x273   : > { %1015 = vmatpush.bf16.msrb.mxu0 %v3308_v40  ;;  %1028 = vmatpush.bf16.msrb.mxu1 %v3312_v42  ;;  %v4333_v40 = vld [vmem:[#allocation12 + $0x34] sm:$0xf]  ;;  %v3464_v42 = vor.u32 %v4371_v32, %v3461_v33  ;;  %v3433_v33 = vld [vmem:[#allocation12 + $0x30] sm:$0xf] }
 0x2e2   : > { %v737_v43 = vpop.f32.mrf.mxu0  ;;  %v750_v44 = vpop.f32.mrf.mxu1 }
 0x2e3   : > { %4674 = vtanh.f32 %v737_v43  ;;  %v3298_v43 = vor.u32 %v4334_v39, %v3297_v38  ;;  %v3425_v39 = vld [vmem:[#allocation12 + $0x20] sm:$0xf] }
 0x2e4   : > { %4676 = vtanh.f32 %v750_v44  ;;  %v3299_v44 = vld [vmem:[#allocation12 + $0x38] sm:$0xf0] }
 0x2e5   : > { %v3302_v48 = vor.u32 %v4333_v40, %v3299_v44  ;;  %928 = vmatpush.bf16.msra.mxu2 %v3298_v43  ;;  %v4364_v40 = vld [vmem:[#allocation12 + $0x24] sm:$0xf0] }
 0x2e6   : > { %v3426_v44 = vor.u32 %v4364_v40, %v3425_v39 }
 0x2e7   : > { %941 = vmatpush.bf16.msra.mxu3 %v3302_v48  ;;  %v4361_v48 = vld [vmem:[#allocation12 + $0x14] sm:$0xf] }
 0x2e9   : > { %v4675_v49 = vpop.eup %4674  ;;  %v763_v50 = vpop.f32.mrf.mxu2 }
 0x2ea   : > { %v776_v51 = vpop.f32.mrf.mxu3  ;;  %v4677_v52 = vpop.eup %4676  ;;  %4678 = vtanh.f32 %v763_v50  ;;  %v3291_v50 = vld [vmem:[#allocation12 + $0x28] sm:$0xf0] }
 0x2eb   : > { %v739_v53 = vpop.f32.mrf.mxu0  ;;  %v752_v54 = vpop.f32.mrf.mxu1  ;;  %v784_v58 = vpack.c.bf16 %v4677_v52, %v4675_v49  ;;  %4680 = vtanh.f32 %v776_v51  ;;  %v4331_v49 = vld [vmem:[#allocation12 + $0x24] sm:$0xf]  ;;  %v3290_v51 = vor.u32 %v4332_v46, %v3289_v45  ;;  %v3417_v46 = vld [vmem:[#allocation12 + $0x10] sm:$0xf] }
 0x2ec   : > { %v3294_v52 = vor.u32 %v4331_v49, %v3291_v50  ;;  %v3281_v53 = vld [vmem:[#allocation12 + $0x10] sm:$0xf]  ;;  %v4330_v54 = vld [vmem:[#allocation12 + $0x14] sm:$0xf0]  ;;  %v3419_v49 = vld [vmem:[#allocation12 + $0x18] sm:$0xf0] }
 0x2ed   : > { %3269 = vmatmul.msk.bf16.vlgmr.msra.gmra.mxu0 %vm834_vm3, %v784_v58  ;;  %3270 = vmatmul.msk.bf16.vlgmr.msra.gmra.mxu1 %vm834_vm3, %v784_v58  ;;  %v877_v62 = vunpack.c.l.b16 %v784_v58  ;;  %v963_v14 = vunpack.c.h.b16 %v784_v58  ;;  %v4329_v58 = vld [vmem:[#allocation12 + $0x14] sm:$0xf] }
 0x2ee   : > { %1178 = vmatpush.bf16.msra.mxu0 %v3400_v55  ;;  %1191 = vmatpush.bf16.msra.mxu1 %v3404_v56  ;;  %v3452_v55 = vor.u32 %v4370_v36, %v3451_v35  ;;  %v3456_v56 = vor.u32 %v4369_v37, %v3453_v47  ;;  %v4365_v35 = vld [vmem:[#allocation12 + $0x34] sm:$0xf]  ;;  %v3435_v36 = vld [vmem:[#allocation12 + $0x38] sm:$0xf0]  ;;  %v4362_v47 = vld [vmem:[#allocation12 + $0x14] sm:$0xf0] }
 0x2ef   : > { %v878_v2 = vpack.c.b16 %v877_v62, %v877_v62  ;;  %v964_v23 = vpack.c.b16 %v963_v14, %v963_v14  ;;  %v3445_v62 = vld [vmem:[#allocation12 + $0x8] sm:$0xf0]  ;;  %929 = vmatpush.bf16.msra.mxu2 %v3290_v51  ;;  %942 = vmatpush.bf16.msra.mxu3 %v3294_v52  ;;  %v3367_v14 = vld [vmem:[#allocation12 + $0x38] sm:$0xf0]  ;;  %v3438_v38 = vor.u32 %v4365_v35, %v3435_v36  ;;  %v3409_v52 = vld [vmem:[#allocation12] sm:$0xf] }
 0x2f0   : > { %v4679_v6 = vpop.eup %4678  ;;  %v3448_v4 = vor.u32 %v4367_v61, %v3445_v62  ;;  %v3418_v50 = vor.u32 %v4362_v47, %v3417_v46  ;;  %v3422_v51 = vor.u32 %v4361_v48, %v3419_v49  ;;  %v4382_v61 = vld [vmem:[#allocation12 + $0x34] sm:$0xf0]  ;;  %v4381_v62 = vld [vmem:[#allocation12 + $0x34] sm:$0xf] }
 0x2f1   : > { %v4681_v7 = vpop.eup %4680  ;;  %v765_v8 = vpop.f32.mrf.mxu2  ;;  %879 = vrot.lane.b32.xlu0 %v878_v2, %s4964_s21  ;;  %v4328_v2 = vld [vmem:[#allocation12 + $0x4] sm:$0xf0] }
 0x2f2   : > { %v778_v9 = vpop.f32.mrf.mxu3  ;;  %v5105_v10 = vpack.c.bf16 %v4681_v7, %v4679_v6  ;;  %1179 = vmatpush.bf16.msra.mxu0 %v3392_v63  ;;  %1192 = vmatpush.bf16.msra.mxu1 %v3396_v0  ;;  %v3282_v63 = vor.u32 %v4330_v54, %v3281_v53  ;;  %v3286_v0 = vor.u32 %v4329_v58, %v3283_v59  ;;  %v3275_v6 = vld [vmem:[#allocation12 + $0x8] sm:$0xf0]  ;;  %v4360_v54 = vld [vmem:[#allocation12 + $0x4] sm:$0xf0] }
 0x2f3   : > { %v3274_v7 = vor.u32 %v4328_v2, %v3273_v1  ;;  %v3278_v8 = vor.u32 %v4327_v5, %v3275_v6  ;;  %v3365_v9 = vld [vmem:[#allocation12 + $0x30] sm:$0xf]  ;;  %v3410_v58 = vor.u32 %v4360_v54, %v3409_v52  ;;  %v3502_v1 = vor.u32 %v4382_v61, %v3501_v60  ;;  %v4380_v6 = vld [vmem:[#allocation12 + $0x24] sm:$0xf0] }
 0x2f4   : > { %v1214_v18 = vunpack.c.l.b16 %v5105_v10  ;;  %v1300_v27 = vunpack.c.h.b16 %v5105_v10  ;;  %930 = vmatpush.bf16.msra.mxu2 %v3282_v63  ;;  %943 = vmatpush.bf16.msra.mxu3 %v3286_v0  ;;  %v3503_v63 = vld [vmem:[#allocation12 + $0x38] sm:$0xf0] }
 0x2f5   : > { %v3506_v2 = vor.u32 %v4381_v62, %v3503_v63 }
 0x2f6   : > { %v1215_v19 = vpack.c.b16 %v1214_v18, %v1214_v18  ;;  %1180 = vmatpush.bf16.msra.mxu0 %v3384_v11  ;;  %1193 = vmatpush.bf16.msra.mxu1 %v3388_v12  ;;  %v1301_v41 = vpack.c.b16 %v1300_v27, %v1300_v27  ;;  %v4350_v11 = vld [vmem:[#allocation12 + $0x34] sm:$0xf0]  ;;  %v4349_v12 = vld [vmem:[#allocation12 + $0x34] sm:$0xf]  ;;  %v4347_v18 = vld [vmem:[#allocation12 + $0x24] sm:$0xf] }
 0x2f7   : > { %v3366_v13 = vor.u32 %v4350_v11, %v3365_v9  ;;  %v3370_v17 = vor.u32 %v4349_v12, %v3367_v14  ;;  %v3341_v27 = vld [vmem:[#allocation12] sm:$0xf] }
 0x2f8   : > { %1216 = vrot.lane.b32.xlu1 %v1215_v19, %s4964_s21  ;;  %931 = vmatpush.bf16.msra.mxu2 %v3274_v7  ;;  %v3359_v19 = vld [vmem:[#allocation12 + $0x28] sm:$0xf0]  ;;  %v4379_v7 = vld [vmem:[#allocation12 + $0x24] sm:$0xf] }
 0x2f9   : > { %1047 = vrot.lane.b32.xlu0 %v964_v23, %s4964_s21  ;;  %944 = vmatpush.bf16.msra.mxu3 %v3278_v8  ;;  %v3495_v8 = vld [vmem:[#allocation12 + $0x28] sm:$0xf0] }
 0x2fa   : > { %1181 = vmatpush.bf16.msra.mxu0 %v3376_v20  ;;  %1194 = vmatpush.bf16.msra.mxu1 %v3380_v21  ;;  %v3358_v20 = vor.u32 %v4348_v16, %v3357_v15  ;;  %v3362_v21 = vor.u32 %v4347_v18, %v3359_v19  ;;  %v3498_v14 = vor.u32 %v4379_v7, %v3495_v8  ;;  %v3485_v15 = vld [vmem:[#allocation12 + $0x10] sm:$0xf]  ;;  %v4378_v16 = vld [vmem:[#allocation12 + $0x14] sm:$0xf0]  ;;  %v3487_v18 = vld [vmem:[#allocation12 + $0x18] sm:$0xf0] }
 0x2fb   : > { %v3486_v19 = vor.u32 %v4378_v16, %v3485_v15 }
 0x2fc   : > { %1096 = vmatpush.bf16.msrb.mxu2 %v3366_v13 }
 0x2fd   : > { %3337 = vmatmul.msk.bf16.vlgmr.msrb.gmra.mxu0 %vm834_vm3, %v964_v23  ;;  %3338 = vmatmul.msk.bf16.vlgmr.msrb.gmra.mxu1 %vm834_vm3, %v964_v23  ;;  %v4345_v23 = vld [vmem:[#allocation12 + $0x14] sm:$0xf] }
 0x2fe   : > { %1349 = vmatpush.bf16.msrb.mxu0 %v3468_v28  ;;  %1362 = vmatpush.bf16.msrb.mxu1 %v3472_v29  ;;  %v3354_v26 = vor.u32 %v4345_v23, %v3351_v25  ;;  %v4344_v28 = vld [vmem:[#allocation12 + $0x4] sm:$0xf0]  ;;  %v4343_v29 = vld [vmem:[#allocation12 + $0x4] sm:$0xf] }
 0x2ff   : > { %1109 = vmatpush.bf16.msrb.mxu3 %v3370_v17  ;;  %v3342_v30 = vor.u32 %v4344_v28, %v3341_v27  ;;  %v3346_v32 = vor.u32 %v4343_v29, %v3343_v31  ;;  %v4377_v17 = vld [vmem:[#allocation12 + $0x14] sm:$0xf]  ;;  %v4375_v23 = vld [vmem:[#allocation12 + $0x4] sm:$0xf] }
 0x300   : > { %1384 = vrot.lane.b32.xlu1 %v1301_v41, %s4964_s21  ;;  %1097 = vmatpush.bf16.msrb.mxu2 %v3358_v20  ;;  %v3490_v20 = vor.u32 %v4377_v17, %v3487_v18 }
 0x302   : > { %1350 = vmatpush.bf16.msrb.mxu0 %v3460_v34  ;;  %1363 = vmatpush.bf16.msrb.mxu1 %v3464_v42  ;;  %v4366_v34 = vld [vmem:[#allocation12 + $0x34] sm:$0xf0]  ;;  %v3427_v42 = vld [vmem:[#allocation12 + $0x28] sm:$0xf0] }
 0x303   : > { %1110 = vmatpush.bf16.msrb.mxu3 %v3362_v21  ;;  %v3434_v37 = vor.u32 %v4366_v34, %v3433_v33  ;;  %v3477_v21 = vld [vmem:[#allocation12] sm:$0xf] }
 0x306   : > { %1351 = vmatpush.bf16.msrb.mxu0 %v3452_v55  ;;  %1364 = vmatpush.bf16.msrb.mxu1 %v3456_v56  ;;  %v4359_v55 = vld [vmem:[#allocation12 + $0x4] sm:$0xf]  ;;  %v3411_v56 = vld [vmem:[#allocation12 + $0x8] sm:$0xf0] }
 0x307   : > { %1111 = vmatpush.bf16.msrb.mxu3 %v3354_v26  ;;  %v3414_v59 = vor.u32 %v4359_v55, %v3411_v56 }
 0x30a   : > { %1352 = vmatpush.bf16.msrb.mxu0 %v3444_v3  ;;  %1365 = vmatpush.bf16.msrb.mxu1 %v3448_v4  ;;  %v3493_v3 = vld [vmem:[#allocation12 + $0x20] sm:$0xf] }
 0x30b   : > { %1112 = vmatpush.bf16.msrb.mxu3 %v3346_v32  ;;  %v3494_v13 = vor.u32 %v4380_v6, %v3493_v3 }
 0x30d   : > { %3405 = vmatmul.msk.bf16.vlgmr.msra.gmra.mxu0 %vm834_vm3, %v5105_v10  ;;  %3406 = vmatmul.msk.bf16.vlgmr.msra.gmra.mxu1 %vm834_vm3, %v5105_v10  ;;  %v3349_v10 = vld [vmem:[#allocation12 + $0x10] sm:$0xf] }
 0x30e   : > { %v3350_v24 = vor.u32 %v4346_v22, %v3349_v10  ;;  %v4376_v22 = vld [vmem:[#allocation12 + $0x4] sm:$0xf0] }
 0x30f   : > { %v3478_v26 = vor.u32 %v4376_v22, %v3477_v21 }
 0x310   : > { %1098 = vmatpush.bf16.msrb.mxu2 %v3350_v24  ;;  %v3479_v24 = vld [vmem:[#allocation12 + $0x8] sm:$0xf0] }
 0x311   : > { %v3482_v27 = vor.u32 %v4375_v23, %v3479_v24 }
 0x314   : > { %1099 = vmatpush.bf16.msrb.mxu2 %v3342_v30 }
 0x31d   : > { %3473 = vmatmul.msk.bf16.vlgmr.msrb.gmra.mxu0 %vm834_vm3, %v1301_v41  ;;  %3474 = vmatmul.msk.bf16.vlgmr.msrb.gmra.mxu1 %vm834_vm3, %v1301_v41  ;;  %v4363_v41 = vld [vmem:[#allocation12 + $0x24] sm:$0xf] }
 0x31e   : > { %v3430_v45 = vor.u32 %v4363_v41, %v3427_v42 }
 0x363   : > { %v880_v43 = vpop.permute.xlu0 %879 }
 0x364   : > { %3303 = vmatmul.msk.bf16.vlgmr.msra.gmra.mxu2 %vm834_vm3, %v880_v43  ;;  %3304 = vmatmul.msk.bf16.vlgmr.msra.gmra.mxu3 %vm834_vm3, %v880_v43 }
 0x365   : > { %1265 = vmatpush.bf16.msra.mxu2 %v3434_v37  ;;  %1278 = vmatpush.bf16.msra.mxu3 %v3438_v38 }
 0x369   : > { %1266 = vmatpush.bf16.msra.mxu2 %v3426_v44  ;;  %1279 = vmatpush.bf16.msra.mxu3 %v3430_v45 }
 0x36a   : > { %v847_v53 = vpop.f32.mrf.mxu0  ;;  %v860_v57 = vpop.f32.mrf.mxu1 }
 0x36b   : > { %4682 = vtanh.f32 %v847_v53  ;;  %v1048_v11 = vpop.permute.xlu0 %1047  ;;  %v1217_v31 = vpop.permute.xlu1 %1216 }
 0x36c   : > { %4684 = vtanh.f32 %v860_v57 }
 0x36d   : > { %1267 = vmatpush.bf16.msra.mxu2 %v3418_v50  ;;  %1280 = vmatpush.bf16.msra.mxu3 %v3422_v51 }
 0x371   : > { %v4683_v0 = vpop.eup %4682  ;;  %1268 = vmatpush.bf16.msra.mxu2 %v3410_v58  ;;  %1281 = vmatpush.bf16.msra.mxu3 %v3414_v59 }
 0x372   : > { %v4685_v4 = vpop.eup %4684  ;;  %v849_v5 = vpop.f32.mrf.mxu0 }
 0x373   : > { %v866_v9 = vpack.c.bf16 %v4685_v4, %v4683_v0  ;;  %v862_v12 = vpop.f32.mrf.mxu1  ;;  %v1385_v39 = vpop.permute.xlu1 %1384 }
 0x374   : > { %3371 = vmatmul.msk.bf16.vlgmr.msrb.gmra.mxu2 %vm834_vm3, %v1048_v11  ;;  %3372 = vmatmul.msk.bf16.vlgmr.msrb.gmra.mxu3 %vm834_vm3, %v1048_v11 }
 0x375   : > { %867 = vst [vmem:[#allocation3] sm:$0xff] %v866_v9  ;;  %1433 = vmatpush.bf16.msrb.mxu2 %v3502_v1  ;;  %1446 = vmatpush.bf16.msrb.mxu3 %v3506_v2 }
 0x379   : > { %1434 = vmatpush.bf16.msrb.mxu2 %v3494_v13  ;;  %1447 = vmatpush.bf16.msrb.mxu3 %v3498_v14 }
 0x37a   : > { %v1017_v10 = vpop.f32.mrf.mxu0 }
 0x37b   : > { %4686 = vtanh.f32 %v1017_v10  ;;  %v1030_v25 = vpop.f32.mrf.mxu1 }
 0x37c   : > { %4688 = vtanh.f32 %v1030_v25 }
 0x37d   : > { %1435 = vmatpush.bf16.msrb.mxu2 %v3486_v19  ;;  %1448 = vmatpush.bf16.msrb.mxu3 %v3490_v20 }
 0x381   : > { %v4687_v28 = vpop.eup %4686  ;;  %1436 = vmatpush.bf16.msrb.mxu2 %v3478_v26  ;;  %1449 = vmatpush.bf16.msrb.mxu3 %v3482_v27 }
 0x382   : > { %v4689_v29 = vpop.eup %4688  ;;  %v1019_v30 = vpop.f32.mrf.mxu0 }
 0x383   : > { %v1036_v32 = vpack.c.bf16 %v4689_v29, %v4687_v28  ;;  %v1032_v33 = vpop.f32.mrf.mxu1 }
 0x384   : > { %3439 = vmatmul.msk.bf16.vlgmr.msra.gmra.mxu2 %vm834_vm3, %v1217_v31  ;;  %3440 = vmatmul.msk.bf16.vlgmr.msra.gmra.mxu3 %vm834_vm3, %v1217_v31 }
 0x385   : > { %1038 = vst [vmem:[#allocation3 + $0x10] sm:$0xff] %v1036_v32 }
 0x38a   : > { %v1183_v34 = vpop.f32.mrf.mxu0 }
 0x38b   : > { %4690 = vtanh.f32 %v1183_v34  ;;  %v1196_v35 = vpop.f32.mrf.mxu1 }
 0x38c   : > { %4692 = vtanh.f32 %v1196_v35 }
 0x391   : > { %v4691_v36 = vpop.eup %4690 }
 0x392   : > { %v4693_v37 = vpop.eup %4692  ;;  %v1185_v38 = vpop.f32.mrf.mxu0 }
 0x393   : > { %v1202_v40 = vpack.c.bf16 %v4693_v37, %v4691_v36  ;;  %v1198_v41 = vpop.f32.mrf.mxu1 }
 0x394   : > { %3507 = vmatmul.msk.bf16.vlgmr.msrb.gmra.mxu2 %vm834_vm3, %v1385_v39  ;;  %3508 = vmatmul.msk.bf16.vlgmr.msrb.gmra.mxu3 %vm834_vm3, %v1385_v39 }
 0x395   : > { %1204 = vst [vmem:[#allocation3 + $0x20] sm:$0xff] %v1202_v40 }
 0x39a   : > { %v1354_v42 = vpop.f32.mrf.mxu0 }
 0x39b   : > { %4694 = vtanh.f32 %v1354_v42  ;;  %v1367_v43 = vpop.f32.mrf.mxu1 }
 0x39c   : > { %4696 = vtanh.f32 %v1367_v43 }
 0x3a1   : > { %v4695_v44 = vpop.eup %4694 }
 0x3a2   : > { %v4697_v45 = vpop.eup %4696  ;;  %v1356_v46 = vpop.f32.mrf.mxu0 }
 0x3a3   : > { %v1373_v47 = vpack.c.bf16 %v4697_v45, %v4695_v44  ;;  %v1369_v48 = vpop.f32.mrf.mxu1 }
 0x3a5   : > { %1375 = vst [vmem:[#allocation3 + $0x30] sm:$0xff] %v1373_v47 }
 0x3e7   : > { %v933_v49 = vpop.f32.mrf.mxu2  ;;  %v946_v50 = vpop.f32.mrf.mxu3 }
 0x3e8   : > { %4698 = vtanh.f32 %v933_v49 }
 0x3e9   : > { %4700 = vtanh.f32 %v946_v50 }
 0x3ee   : > { %v4699_v51 = vpop.eup %4698 }
 0x3ef   : > { %v4701_v52 = vpop.eup %4700  ;;  %v935_v53 = vpop.f32.mrf.mxu2 }
 0x3f0   : > { %v948_v54 = vpop.f32.mrf.mxu3  ;;  %v952_v55 = vpack.c.bf16 %v4701_v52, %v4699_v51 }
 0x3f2   : > { %954 = vst [vmem:[#allocation3 + $0x8] sm:$0xff] %v952_v55 }
 0x3f7   : > { %v1101_v56 = vpop.f32.mrf.mxu2 }
 0x3f8   : > { %v1114_v57 = vpop.f32.mrf.mxu3  ;;  %4702 = vtanh.f32 %v1101_v56 }
 0x3f9   : > { %4704 = vtanh.f32 %v1114_v57 }
 0x3fe   : > { %v4703_v58 = vpop.eup %4702 }
 0x3ff   : > { %v4705_v59 = vpop.eup %4704  ;;  %v1103_v60 = vpop.f32.mrf.mxu2 }
 0x400   : > { %v1116_v61 = vpop.f32.mrf.mxu3  ;;  %v1120_v62 = vpack.c.bf16 %v4705_v59, %v4703_v58 }
 0x402   : > { %1122 = vst [vmem:[#allocation3 + $0x18] sm:$0xff] %v1120_v62 }
 0x407   : > { %v1270_v63 = vpop.f32.mrf.mxu2 }
 0x408   : > { %v1283_v0 = vpop.f32.mrf.mxu3  ;;  %4706 = vtanh.f32 %v1270_v63 }
 0x409   : > { %4708 = vtanh.f32 %v1283_v0 }
 0x40e   : > { %v4707_v1 = vpop.eup %4706 }
 0x40f   : > { %v4709_v2 = vpop.eup %4708  ;;  %v1272_v3 = vpop.f32.mrf.mxu2 }
 0x410   : > { %v1285_v4 = vpop.f32.mrf.mxu3  ;;  %v1289_v5 = vpack.c.bf16 %v4709_v2, %v4707_v1 }
 0x412   : > { %1291 = vst [vmem:[#allocation3 + $0x28] sm:$0xff] %v1289_v5 }
 0x417   : > { %v1438_v6 = vpop.f32.mrf.mxu2 }
 0x418   : > { %v1451_v7 = vpop.f32.mrf.mxu3  ;;  %4710 = vtanh.f32 %v1438_v6 }
 0x419   : > { %4712 = vtanh.f32 %v1451_v7 }
 0x41e   : > { %v4711_v8 = vpop.eup %4710 }
 0x41f   : > { %v4713_v9 = vpop.eup %4712  ;;  %v1440_v11 = vpop.f32.mrf.mxu2 }
 0x420   : > { %v1453_v12 = vpop.f32.mrf.mxu3  ;;  %v1457_v13 = vpack.c.bf16 %v4713_v9, %v4711_v8 }
 0x422   : > { %1459 = vst [vmem:[#allocation3 + $0x38] sm:$0xff] %v1457_v13 }
 0x423 PF: > { %v3849_v14 = vld [vmem:[#allocation14 + $0x2a0] sm:$0xf]  ;;  %v4474_v15 = vld [vmem:[#allocation14 + $0x2cc] sm:$0xf0]  ;;  %v4468_v19 = vld [vmem:[#allocation14 + $0x2a4] sm:$0xf] }
 0x424   : > { %v4233_v16 = vld [vmem:[#allocation14 + $0x5a0] sm:$0xf]  ;;  %v3850_v17 = vor.u32 %v4474_v15, %v3849_v14  ;;  %v4570_v18 = vld [vmem:[#allocation14 + $0x5cc] sm:$0xf0]  ;;  %v3851_v20 = vld [vmem:[#allocation14 + $0x2d0] sm:$0xf0] }
 0x425   : > { %v4234_v21 = vor.u32 %v4570_v18, %v4233_v16  ;;  %v3854_v10 = vor.u32 %v4468_v19, %v3851_v20  ;;  %v4564_v22 = vld [vmem:[#allocation14 + $0x5a4] sm:$0xf]  ;;  %v4235_v23 = vld [vmem:[#allocation14 + $0x5d0] sm:$0xf0]  ;;  %v3801_v24 = vld [vmem:[#allocation14 + $0x240] sm:$0xf] }
 0x426   : > { %2623 = vmatpush.bf16.msra.mxu0 %v3850_v17  ;;  %v4238_v25 = vor.u32 %v4564_v22, %v4235_v23  ;;  %v4462_v26 = vld [vmem:[#allocation14 + $0x26c] sm:$0xf0]  ;;  %v4185_v27 = vld [vmem:[#allocation14 + $0x540] sm:$0xf]  ;;  %v4456_v31 = vld [vmem:[#allocation14 + $0x244] sm:$0xf] }
 0x427   : > { %v4558_v28 = vld [vmem:[#allocation14 + $0x56c] sm:$0xf0]  ;;  %2636 = vmatpush.bf16.msra.mxu1 %v4234_v21  ;;  %2649 = vmatpush.bf16.msra.mxu2 %v3854_v10  ;;  %v3802_v29 = vor.u32 %v4462_v26, %v3801_v24  ;;  %v3803_v32 = vld [vmem:[#allocation14 + $0x270] sm:$0xf0]  ;;  %v4552_v33 = vld [vmem:[#allocation14 + $0x544] sm:$0xf] }
 0x428   : > { %v4186_v30 = vor.u32 %v4558_v28, %v4185_v27  ;;  %2662 = vmatpush.bf16.msra.mxu3 %v4238_v25  ;;  %v3806_v34 = vor.u32 %v4456_v31, %v3803_v32  ;;  %v4187_v35 = vld [vmem:[#allocation14 + $0x570] sm:$0xf0]  ;;  %v3753_v36 = vld [vmem:[#allocation14 + $0x1e0] sm:$0xf]  ;;  %v4450_v37 = vld [vmem:[#allocation14 + $0x20c] sm:$0xf0] }
 0x429   : > { %v4190_v38 = vor.u32 %v4552_v33, %v4187_v35  ;;  %v4137_v39 = vld [vmem:[#allocation14 + $0x4e0] sm:$0xf]  ;;  %v4546_v40 = vld [vmem:[#allocation14 + $0x50c] sm:$0xf0]  ;;  %v4444_v41 = vld [vmem:[#allocation14 + $0x1e4] sm:$0xf]  ;;  %v3754_v42 = vor.u32 %v4450_v37, %v3753_v36 }
 0x42a   : > { %2624 = vmatpush.bf16.msra.mxu0 %v3802_v29  ;;  %v3755_v43 = vld [vmem:[#allocation14 + $0x210] sm:$0xf0]  ;;  %v4540_v44 = vld [vmem:[#allocation14 + $0x4e4] sm:$0xf]  ;;  %v4138_v46 = vor.u32 %v4546_v40, %v4137_v39  ;;  %v3705_v48 = vld [vmem:[#allocation14 + $0x180] sm:$0xf] }
 0x42b   : > { %v4139_v45 = vld [vmem:[#allocation14 + $0x510] sm:$0xf0]  ;;  %2637 = vmatpush.bf16.msra.mxu1 %v4186_v30  ;;  %2650 = vmatpush.bf16.msra.mxu2 %v3806_v34  ;;  %v3758_v47 = vor.u32 %v4444_v41, %v3755_v43  ;;  %v4438_v49 = vld [vmem:[#allocation14 + $0x1ac] sm:$0xf0]  ;;  %v4089_v50 = vld [vmem:[#allocation14 + $0x480] sm:$0xf] }
 0x42c   : > { %2663 = vmatpush.bf16.msra.mxu3 %v4190_v38  ;;  %v4142_v51 = vor.u32 %v4540_v44, %v4139_v45  ;;  %v4534_v52 = vld [vmem:[#allocation14 + $0x4ac] sm:$0xf0]  ;;  %v4432_v53 = vld [vmem:[#allocation14 + $0x184] sm:$0xf]  ;;  %v3707_v54 = vld [vmem:[#allocation14 + $0x1b0] sm:$0xf0]  ;;  %v3706_v57 = vor.u32 %v4438_v49, %v3705_v48 }
 0x42d   : > { %v4528_v55 = vld [vmem:[#allocation14 + $0x484] sm:$0xf]  ;;  %v4091_v56 = vld [vmem:[#allocation14 + $0x4b0] sm:$0xf0]  ;;  %v4090_v58 = vor.u32 %v4534_v52, %v4089_v50  ;;  %v3710_v59 = vor.u32 %v4432_v53, %v3707_v54  ;;  %v3657_v60 = vld [vmem:[#allocation14 + $0x120] sm:$0xf] }
 0x42e   : > { %2625 = vmatpush.bf16.msra.mxu0 %v3754_v42  ;;  %v4426_v61 = vld [vmem:[#allocation14 + $0x14c] sm:$0xf0]  ;;  %v4041_v62 = vld [vmem:[#allocation14 + $0x420] sm:$0xf]  ;;  %v4094_v63 = vor.u32 %v4528_v55, %v4091_v56  ;;  %v4420_v1 = vld [vmem:[#allocation14 + $0x124] sm:$0xf] }
 0x42f   : > { %2638 = vmatpush.bf16.msra.mxu1 %v4138_v46  ;;  %2651 = vmatpush.bf16.msra.mxu2 %v3758_v47  ;;  %v4522_v0 = vld [vmem:[#allocation14 + $0x44c] sm:$0xf0]  ;;  %v3659_v2 = vld [vmem:[#allocation14 + $0x150] sm:$0xf0]  ;;  %v4516_v3 = vld [vmem:[#allocation14 + $0x424] sm:$0xf]  ;;  %v3658_v5 = vor.u32 %v4426_v61, %v3657_v60 }
 0x430   : > { %2664 = vmatpush.bf16.msra.mxu3 %v4142_v51  ;;  %v4043_v4 = vld [vmem:[#allocation14 + $0x450] sm:$0xf0]  ;;  %v4042_v6 = vor.u32 %v4522_v0, %v4041_v62  ;;  %v3662_v7 = vor.u32 %v4420_v1, %v3659_v2  ;;  %v3609_v8 = vld [vmem:[#allocation14 + $0xc0] sm:$0xf]  ;;  %v4414_v9 = vld [vmem:[#allocation14 + $0xec] sm:$0xf0] }
 0x431   : > { %v3993_v11 = vld [vmem:[#allocation14 + $0x3c0] sm:$0xf]  ;;  %v4046_v12 = vor.u32 %v4516_v3, %v4043_v4  ;;  %v4510_v13 = vld [vmem:[#allocation14 + $0x3ec] sm:$0xf0]  ;;  %v4408_v14 = vld [vmem:[#allocation14 + $0xc4] sm:$0xf]  ;;  %v3610_v18 = vor.u32 %v4414_v9, %v3609_v8 }
 0x432   : > { %2626 = vmatpush.bf16.msra.mxu0 %v3706_v57  ;;  %v3611_v15 = vld [vmem:[#allocation14 + $0xf0] sm:$0xf0]  ;;  %v4504_v16 = vld [vmem:[#allocation14 + $0x3c4] sm:$0xf]  ;;  %v3994_v19 = vor.u32 %v4510_v13, %v3993_v11  ;;  %v3561_v21 = vld [vmem:[#allocation14 + $0x60] sm:$0xf] }
 0x433   : > { %2639 = vmatpush.bf16.msra.mxu1 %v4090_v58  ;;  %2652 = vmatpush.bf16.msra.mxu2 %v3710_v59  ;;  %v3995_v17 = vld [vmem:[#allocation14 + $0x3f0] sm:$0xf0]  ;;  %v3614_v20 = vor.u32 %v4408_v14, %v3611_v15  ;;  %v4402_v10 = vld [vmem:[#allocation14 + $0x8c] sm:$0xf0]  ;;  %v3945_v22 = vld [vmem:[#allocation14 + $0x360] sm:$0xf] }
 0x434   : > { %2665 = vmatpush.bf16.msra.mxu3 %v4094_v63  ;;  %v3998_v23 = vor.u32 %v4504_v16, %v3995_v17  ;;  %v4498_v24 = vld [vmem:[#allocation14 + $0x38c] sm:$0xf0]  ;;  %v4396_v25 = vld [vmem:[#allocation14 + $0x64] sm:$0xf]  ;;  %v3563_v26 = vld [vmem:[#allocation14 + $0x90] sm:$0xf0]  ;;  %v3562_v29 = vor.u32 %v4402_v10, %v3561_v21 }
 0x435   : > { %v4492_v27 = vld [vmem:[#allocation14 + $0x364] sm:$0xf]  ;;  %v3947_v28 = vld [vmem:[#allocation14 + $0x390] sm:$0xf0]  ;;  %v3513_v30 = vld [vmem:[#allocation14] sm:$0xf]  ;;  %v3946_v32 = vor.u32 %v4498_v24, %v3945_v22  ;;  %v3566_v33 = vor.u32 %v4396_v25, %v3563_v26 }
 0x436   : > { %2627 = vmatpush.bf16.msra.mxu0 %v3658_v5  ;;  %v4390_v31 = vld [vmem:[#allocation14 + $0x2c] sm:$0xf0]  ;;  %v3897_v34 = vld [vmem:[#allocation14 + $0x300] sm:$0xf]  ;;  %v4384_v36 = vld [vmem:[#allocation14 + $0x4] sm:$0xf]  ;;  %v3950_v37 = vor.u32 %v4492_v27, %v3947_v28 }
 0x437   : > { %2640 = vmatpush.bf16.msra.mxu1 %v4042_v6  ;;  %2653 = vmatpush.bf16.msra.mxu2 %v3662_v7  ;;  %v4486_v35 = vld [vmem:[#allocation14 + $0x32c] sm:$0xf0]  ;;  %v3515_v38 = vld [vmem:[#allocation14 + $0x30] sm:$0xf0]  ;;  %v4480_v39 = vld [vmem:[#allocation14 + $0x304] sm:$0xf]  ;;  %v3514_v44 = vor.u32 %v4390_v31, %v3513_v30 }
 0x438   : > { %2666 = vmatpush.bf16.msra.mxu3 %v4046_v12  ;;  %v3899_v40 = vld [vmem:[#allocation14 + $0x330] sm:$0xf0]  ;;  %v3857_v41 = vld [vmem:[#allocation14 + $0x2a8] sm:$0xf]  ;;  %v4475_v42 = vld [vmem:[#allocation14 + $0x2d4] sm:$0xf0]  ;;  %v3898_v48 = vor.u32 %v4486_v35, %v3897_v34  ;;  %v3518_v49 = vor.u32 %v4384_v36, %v3515_v38 }
 0x439   : > { %v4241_v43 = vld [vmem:[#allocation14 + $0x5a8] sm:$0xf]  ;;  %v4571_v45 = vld [vmem:[#allocation14 + $0x5d4] sm:$0xf0]  ;;  %v4469_v46 = vld [vmem:[#allocation14 + $0x2ac] sm:$0xf]  ;;  %v3902_v52 = vor.u32 %v4480_v39, %v3899_v40  ;;  %v3858_v53 = vor.u32 %v4475_v42, %v3857_v41 }
 0x43a   : > { %2628 = vmatpush.bf16.msra.mxu0 %v3610_v18  ;;  %v3859_v47 = vld [vmem:[#allocation14 + $0x2d8] sm:$0xf0]  ;;  %v4565_v50 = vld [vmem:[#allocation14 + $0x5ac] sm:$0xf]  ;;  %v4242_v54 = vor.u32 %v4571_v45, %v4241_v43  ;;  %v3809_v56 = vld [vmem:[#allocation14 + $0x248] sm:$0xf] }
 0x43b   : > { %2641 = vmatpush.bf16.msra.mxu1 %v3994_v19  ;;  %2654 = vmatpush.bf16.msra.mxu2 %v3614_v20  ;;  %v4243_v51 = vld [vmem:[#allocation14 + $0x5d8] sm:$0xf0]  ;;  %v3862_v55 = vor.u32 %v4469_v46, %v3859_v47  ;;  %v4463_v57 = vld [vmem:[#allocation14 + $0x274] sm:$0xf0]  ;;  %v4193_v58 = vld [vmem:[#allocation14 + $0x548] sm:$0xf] }
 0x43c   : > { %2667 = vmatpush.bf16.msra.mxu3 %v3998_v23  ;;  %v4246_v59 = vor.u32 %v4565_v50, %v4243_v51  ;;  %v4559_v60 = vld [vmem:[#allocation14 + $0x574] sm:$0xf0]  ;;  %v4457_v61 = vld [vmem:[#allocation14 + $0x24c] sm:$0xf]  ;;  %v3811_v62 = vld [vmem:[#allocation14 + $0x278] sm:$0xf0]  ;;  %v3810_v1 = vor.u32 %v4463_v57, %v3809_v56 }
 0x43d   : > { %v4553_v63 = vld [vmem:[#allocation14 + $0x54c] sm:$0xf]  ;;  %v4195_v0 = vld [vmem:[#allocation14 + $0x578] sm:$0xf0]  ;;  %v4194_v2 = vor.u32 %v4559_v60, %v4193_v58  ;;  %v3814_v3 = vor.u32 %v4457_v61, %v3811_v62  ;;  %v3761_v4 = vld [vmem:[#allocation14 + $0x1e8] sm:$0xf] }
 0x43e   : > { %2629 = vmatpush.bf16.msra.mxu0 %v3562_v29  ;;  %v4451_v5 = vld [vmem:[#allocation14 + $0x214] sm:$0xf0]  ;;  %v4145_v6 = vld [vmem:[#allocation14 + $0x4e8] sm:$0xf]  ;;  %v4198_v7 = vor.u32 %v4553_v63, %v4195_v0  ;;  %v4445_v9 = vld [vmem:[#allocation14 + $0x1ec] sm:$0xf] }
 0x43f   : > { %2642 = vmatpush.bf16.msra.mxu1 %v3946_v32  ;;  %2655 = vmatpush.bf16.msra.mxu2 %v3566_v33  ;;  %v4547_v8 = vld [vmem:[#allocation14 + $0x514] sm:$0xf0]  ;;  %v3763_v11 = vld [vmem:[#allocation14 + $0x218] sm:$0xf0]  ;;  %v4541_v12 = vld [vmem:[#allocation14 + $0x4ec] sm:$0xf]  ;;  %v3762_v14 = vor.u32 %v4451_v5, %v3761_v4 }
 0x440   : > { %2668 = vmatpush.bf16.msra.mxu3 %v3950_v37  ;;  %v4147_v13 = vld [vmem:[#allocation14 + $0x518] sm:$0xf0]  ;;  %v3713_v15 = vld [vmem:[#allocation14 + $0x188] sm:$0xf]  ;;  %v4439_v16 = vld [vmem:[#allocation14 + $0x1b4] sm:$0xf0]  ;;  %v4146_v17 = vor.u32 %v4547_v8, %v4145_v6  ;;  %v3766_v18 = vor.u32 %v4445_v9, %v3763_v11 }
 0x441   : > { %s4383_s24 = sshll.u32 %s5019_s9, 3  ;;  %v4097_v19 = vld [vmem:[#allocation14 + $0x488] sm:$0xf]  ;;  %v4535_v20 = vld [vmem:[#allocation14 + $0x4b4] sm:$0xf0]  ;;  %v4150_v21 = vor.u32 %v4541_v12, %v4147_v13  ;;  %v3714_v28 = vor.u32 %v4439_v16, %v3713_v15 }
 0x442   : > { %2630 = vmatpush.bf16.msra.mxu0 %v3514_v44  ;;  %v4433_v10 = vld [vmem:[#allocation14 + $0x18c] sm:$0xf]  ;;  %v3715_v22 = vld [vmem:[#allocation14 + $0x1b8] sm:$0xf0]  ;;  %s1462_s25 = scalar_lea.vmem [#allocation3], %s4383_s24  ;;  %v4098_v29 = vor.u32 %v4535_v20, %v4097_v19 }
 0x443   : > { %2643 = vmatpush.bf16.msra.mxu1 %v3898_v48  ;;  %2656 = vmatpush.bf16.msra.mxu2 %v3518_v49  ;;  %v1463_v23 = vld [vmem:[%s1462_s25] sm:$0xff]  ;;  %v4099_v25 = vld [vmem:[#allocation14 + $0x4b8] sm:$0xf0]  ;;  %v3718_v30 = vor.u32 %v4433_v10, %v3715_v22  ;;  %v4427_v32 = vld [vmem:[#allocation14 + $0x154] sm:$0xf0] }
 0x444   : > { %2669 = vmatpush.bf16.msra.mxu3 %v3902_v52  ;;  %v4529_v24 = vld [vmem:[#allocation14 + $0x48c] sm:$0xf]  ;;  %v1657_v26 = vunpack.c.l.b16 %v1463_v23  ;;  %v1658_v27 = vunpack.c.h.b16 %v1463_v23  ;;  %v3665_v31 = vld [vmem:[#allocation14 + $0x128] sm:$0xf]  ;;  %v4523_v37 = vld [vmem:[#allocation14 + $0x454] sm:$0xf0] }
 0x445   : > { %v4049_v33 = vld [vmem:[#allocation14 + $0x428] sm:$0xf]  ;;  %v4102_v36 = vor.u32 %v4529_v24, %v4099_v25  ;;  %v4421_v38 = vld [vmem:[#allocation14 + $0x12c] sm:$0xf]  ;;  %v3667_v39 = vld [vmem:[#allocation14 + $0x158] sm:$0xf0]  ;;  %v3666_v42 = vor.u32 %v4427_v32, %v3665_v31 }
 0x446   : > { %2675 = vmatpush.bf16.msrb.mxu0 %v3858_v53  ;;  %v5129_v34 = vpack.c.b16 %v1657_v26, %v1657_v26  ;;  %v5131_v35 = vpack.c.b16 %v1658_v27, %v1658_v27  ;;  %v4517_v40 = vld [vmem:[#allocation14 + $0x42c] sm:$0xf]  ;;  %v4051_v41 = vld [vmem:[#allocation14 + $0x458] sm:$0xf0]  ;;  %v4050_v43 = vor.u32 %v4523_v37, %v4049_v33  ;;  %v3670_v44 = vor.u32 %v4421_v38, %v3667_v39  ;;  %v3617_v45 = vld [vmem:[#allocation14 + $0xc8] sm:$0xf] }
 0x447   : > { %2688 = vmatpush.bf16.msrb.mxu1 %v4242_v54  ;;  %2701 = vmatpush.bf16.msrb.mxu2 %v3862_v55  ;;  %v4415_v46 = vld [vmem:[#allocation14 + $0xf4] sm:$0xf0]  ;;  %v4001_v47 = vld [vmem:[#allocation14 + $0x3c8] sm:$0xf]  ;;  %v4054_v48 = vor.u32 %v4517_v40, %v4051_v41  ;;  %v4409_v50 = vld [vmem:[#allocation14 + $0xcc] sm:$0xf] }
 0x448   : > { %2714 = vmatpush.bf16.msrb.mxu3 %v4246_v59  ;;  %2657 = vmatmul.bf16.vlgmr.msra.gmra.mxu2 %v5129_v34  ;;  %v4511_v49 = vld [vmem:[#allocation14 + $0x3f4] sm:$0xf0]  ;;  %v3619_v51 = vld [vmem:[#allocation14 + $0xf8] sm:$0xf0]  ;;  %v4505_v52 = vld [vmem:[#allocation14 + $0x3cc] sm:$0xf]  ;;  %v3618_v54 = vor.u32 %v4415_v46, %v3617_v45 }
 0x449   : > { %2670 = vmatmul.bf16.vlgmr.msra.gmra.mxu3 %v5131_v35  ;;  %2644 = vmatmul.bf16.vlgmr.msra.gmra.mxu1 %v5131_v35  ;;  %v4003_v53 = vld [vmem:[#allocation14 + $0x3f8] sm:$0xf0]  ;;  %v4002_v55 = vor.u32 %v4511_v49, %v4001_v47  ;;  %v3622_v56 = vor.u32 %v4409_v50, %v3619_v51  ;;  %v3569_v57 = vld [vmem:[#allocation14 + $0x68] sm:$0xf]  ;;  %v4403_v58 = vld [vmem:[#allocation14 + $0x94] sm:$0xf0] }
 0x44a   : > { %2676 = vmatpush.bf16.msrb.mxu0 %v3810_v1  ;;  %v3953_v59 = vld [vmem:[#allocation14 + $0x368] sm:$0xf]  ;;  %v4006_v60 = vor.u32 %v4505_v52, %v4003_v53  ;;  %v4499_v61 = vld [vmem:[#allocation14 + $0x394] sm:$0xf0]  ;;  %v4397_v62 = vld [vmem:[#allocation14 + $0x6c] sm:$0xf] }
 0x44b   : > { %2689 = vmatpush.bf16.msrb.mxu1 %v4194_v2  ;;  %2702 = vmatpush.bf16.msrb.mxu2 %v3814_v3  ;;  %v3571_v63 = vld [vmem:[#allocation14 + $0x98] sm:$0xf0]  ;;  %v4493_v0 = vld [vmem:[#allocation14 + $0x36c] sm:$0xf]  ;;  %v3570_v2 = vor.u32 %v4403_v58, %v3569_v57  ;;  %v3521_v3 = vld [vmem:[#allocation14 + $0x8] sm:$0xf]  ;;  %v3954_v5 = vor.u32 %v4499_v61, %v3953_v59 }
 0x44c   : > { %2715 = vmatpush.bf16.msrb.mxu3 %v4198_v7  ;;  %2631 = vmatmul.bf16.vlgmr.msra.gmra.mxu0 %v5129_v34  ;;  %v3955_v1 = vld [vmem:[#allocation14 + $0x398] sm:$0xf0]  ;;  %v4391_v4 = vld [vmem:[#allocation14 + $0x34] sm:$0xf0]  ;;  %v3574_v6 = vor.u32 %v4397_v62, %v3571_v63  ;;  %v3905_v7 = vld [vmem:[#allocation14 + $0x308] sm:$0xf] }
 0x44d   : > { %v4487_v8 = vld [vmem:[#allocation14 + $0x334] sm:$0xf0]  ;;  %v4385_v9 = vld [vmem:[#allocation14 + $0xc] sm:$0xf]  ;;  %v3958_v11 = vor.u32 %v4493_v0, %v3955_v1  ;;  %v3523_v12 = vld [vmem:[#allocation14 + $0x38] sm:$0xf0] }
 0x44e   : > { %2677 = vmatpush.bf16.msrb.mxu0 %v3762_v14  ;;  %v4481_v13 = vld [vmem:[#allocation14 + $0x30c] sm:$0xf]  ;;  %v3907_v14 = vld [vmem:[#allocation14 + $0x338] sm:$0xf0]  ;;  %v3865_v15 = vld [vmem:[#allocation14 + $0x2b0] sm:$0xf]  ;;  %v3906_v10 = vor.u32 %v4487_v8, %v3905_v7  ;;  %v3526_v22 = vor.u32 %v4385_v9, %v3523_v12 }
 0x44f   : > { %2690 = vmatpush.bf16.msrb.mxu1 %v4146_v17  ;;  %2703 = vmatpush.bf16.msrb.mxu2 %v3766_v18  ;;  %v4476_v16 = vld [vmem:[#allocation14 + $0x2dc] sm:$0xf0]  ;;  %v4249_v17 = vld [vmem:[#allocation14 + $0x5b0] sm:$0xf]  ;;  %v3522_v18 = vor.u32 %v4391_v4, %v3521_v3  ;;  %v4470_v20 = vld [vmem:[#allocation14 + $0x2b4] sm:$0xf]  ;;  %v3910_v25 = vor.u32 %v4481_v13, %v3907_v14 }
 0x450   : > { %2716 = vmatpush.bf16.msrb.mxu3 %v4150_v21  ;;  %v4572_v19 = vld [vmem:[#allocation14 + $0x5dc] sm:$0xf0]  ;;  %v3867_v21 = vld [vmem:[#allocation14 + $0x2e0] sm:$0xf0]  ;;  %v4566_v23 = vld [vmem:[#allocation14 + $0x5b4] sm:$0xf]  ;;  %v3866_v26 = vor.u32 %v4476_v16, %v3865_v15 }
 0x451   : > { %v4251_v24 = vld [vmem:[#allocation14 + $0x5e0] sm:$0xf0]  ;;  %v4250_v27 = vor.u32 %v4572_v19, %v4249_v17  ;;  %v4201_v31 = vld [vmem:[#allocation14 + $0x550] sm:$0xf]  ;;  %v4560_v33 = vld [vmem:[#allocation14 + $0x57c] sm:$0xf0] }
 0x452   : > { %2678 = vmatpush.bf16.msrb.mxu0 %v3714_v28  ;;  %v3870_v28 = vor.u32 %v4470_v20, %v3867_v21  ;;  %v4254_v32 = vor.u32 %v4566_v23, %v4251_v24  ;;  %v3819_v37 = vld [vmem:[#allocation14 + $0x280] sm:$0xf0]  ;;  %v4554_v38 = vld [vmem:[#allocation14 + $0x554] sm:$0xf]  ;;  %v4202_v41 = vor.u32 %v4560_v33, %v4201_v31  ;;  %v4153_v45 = vld [vmem:[#allocation14 + $0x4f0] sm:$0xf] }
 0x453   : > { %2691 = vmatpush.bf16.msrb.mxu1 %v4098_v29  ;;  %2704 = vmatpush.bf16.msrb.mxu2 %v3718_v30  ;;  %v3817_v29 = vld [vmem:[#allocation14 + $0x250] sm:$0xf]  ;;  %v4464_v30 = vld [vmem:[#allocation14 + $0x27c] sm:$0xf0]  ;;  %v4203_v39 = vld [vmem:[#allocation14 + $0x580] sm:$0xf0] }
 0x454   : > { %2717 = vmatpush.bf16.msrb.mxu3 %v4102_v36  ;;  %v4458_v36 = vld [vmem:[#allocation14 + $0x254] sm:$0xf]  ;;  %v3818_v40 = vor.u32 %v4464_v30, %v3817_v29  ;;  %v4206_v46 = vor.u32 %v4554_v38, %v4203_v39  ;;  %v4548_v47 = vld [vmem:[#allocation14 + $0x51c] sm:$0xf0]  ;;  %v3771_v49 = vld [vmem:[#allocation14 + $0x220] sm:$0xf0] }
 0x455   : > { %v4542_v50 = vld [vmem:[#allocation14 + $0x4f4] sm:$0xf]  ;;  %v4155_v51 = vld [vmem:[#allocation14 + $0x520] sm:$0xf0]  ;;  %v4154_v53 = vor.u32 %v4548_v47, %v4153_v45  ;;  %v4105_v57 = vld [vmem:[#allocation14 + $0x490] sm:$0xf] }
 0x456   : > { %2679 = vmatpush.bf16.msrb.mxu0 %v3666_v42  ;;  %v3822_v42 = vor.u32 %v4458_v36, %v3819_v37  ;;  %v4158_v58 = vor.u32 %v4542_v50, %v4155_v51  ;;  %v4536_v59 = vld [vmem:[#allocation14 + $0x4bc] sm:$0xf0]  ;;  %v3723_v61 = vld [vmem:[#allocation14 + $0x1c0] sm:$0xf0]  ;;  %v4530_v62 = vld [vmem:[#allocation14 + $0x494] sm:$0xf] }
 0x457   : > { %2692 = vmatpush.bf16.msrb.mxu1 %v4050_v43  ;;  %2705 = vmatpush.bf16.msrb.mxu2 %v3670_v44  ;;  %v3769_v43 = vld [vmem:[#allocation14 + $0x1f0] sm:$0xf]  ;;  %v4452_v44 = vld [vmem:[#allocation14 + $0x21c] sm:$0xf0]  ;;  %v4107_v63 = vld [vmem:[#allocation14 + $0x4c0] sm:$0xf0]  ;;  %v4106_v1 = vor.u32 %v4536_v59, %v4105_v57 }
 0x458   : > { %2718 = vmatpush.bf16.msrb.mxu3 %v4054_v48  ;;  %v4446_v48 = vld [vmem:[#allocation14 + $0x1f4] sm:$0xf]  ;;  %v3770_v52 = vor.u32 %v4452_v44, %v3769_v43  ;;  %v3673_v3 = vld [vmem:[#allocation14 + $0x130] sm:$0xf]  ;;  %v4428_v4 = vld [vmem:[#allocation14 + $0x15c] sm:$0xf0] }
 0x459   : > { %v4524_v7 = vld [vmem:[#allocation14 + $0x45c] sm:$0xf0]  ;;  %v4422_v8 = vld [vmem:[#allocation14 + $0x134] sm:$0xf]  ;;  %v3675_v9 = vld [vmem:[#allocation14 + $0x160] sm:$0xf0]  ;;  %v3674_v13 = vor.u32 %v4428_v4, %v3673_v3 }
 0x45a   : > { %2680 = vmatpush.bf16.msrb.mxu0 %v3618_v54  ;;  %v3774_v54 = vor.u32 %v4446_v48, %v3771_v49  ;;  %v4059_v12 = vld [vmem:[#allocation14 + $0x460] sm:$0xf0]  ;;  %v3678_v15 = vor.u32 %v4422_v8, %v3675_v9  ;;  %v3625_v16 = vld [vmem:[#allocation14 + $0xd0] sm:$0xf]  ;;  %v4416_v17 = vld [vmem:[#allocation14 + $0xfc] sm:$0xf0] }
 0x45b   : > { %2693 = vmatpush.bf16.msrb.mxu1 %v4002_v55  ;;  %2706 = vmatpush.bf16.msrb.mxu2 %v3622_v56  ;;  %v3721_v55 = vld [vmem:[#allocation14 + $0x190] sm:$0xf]  ;;  %v4440_v56 = vld [vmem:[#allocation14 + $0x1bc] sm:$0xf0]  ;;  %v4410_v21 = vld [vmem:[#allocation14 + $0xd4] sm:$0xf]  ;;  %v3626_v24 = vor.u32 %v4416_v17, %v3625_v16 }
 0x45c   : > { %2719 = vmatpush.bf16.msrb.mxu3 %v4006_v60  ;;  %v4434_v60 = vld [vmem:[#allocation14 + $0x194] sm:$0xf]  ;;  %v3722_v0 = vor.u32 %v4440_v56, %v3721_v55  ;;  %v4512_v20 = vld [vmem:[#allocation14 + $0x3fc] sm:$0xf0]  ;;  %v4011_v23 = vld [vmem:[#allocation14 + $0x400] sm:$0xf0] }
 0x45d   : > { %v3961_v29 = vld [vmem:[#allocation14 + $0x370] sm:$0xf]  ;;  %v4500_v31 = vld [vmem:[#allocation14 + $0x39c] sm:$0xf0]  ;;  %v3579_v33 = vld [vmem:[#allocation14 + $0xa0] sm:$0xf0] }
 0x45e   : > { %2681 = vmatpush.bf16.msrb.mxu0 %v3570_v2  ;;  %v3726_v2 = vor.u32 %v4434_v60, %v3723_v61  ;;  %v4494_v36 = vld [vmem:[#allocation14 + $0x374] sm:$0xf]  ;;  %v3963_v37 = vld [vmem:[#allocation14 + $0x3a0] sm:$0xf0]  ;;  %v3529_v39 = vld [vmem:[#allocation14 + $0x10] sm:$0xf] }
 0x45f   : > { %2694 = vmatpush.bf16.msrb.mxu1 %v3954_v5  ;;  %2707 = vmatpush.bf16.msrb.mxu2 %v3574_v6  ;;  %v4057_v5 = vld [vmem:[#allocation14 + $0x430] sm:$0xf]  ;;  %v4110_v6 = vor.u32 %v4530_v62, %v4107_v63  ;;  %v4488_v44 = vld [vmem:[#allocation14 + $0x33c] sm:$0xf0]  ;;  %v4386_v45 = vld [vmem:[#allocation14 + $0x14] sm:$0xf] }
 0x460   : > { %2720 = vmatpush.bf16.msrb.mxu3 %v3958_v11  ;;  %v4518_v11 = vld [vmem:[#allocation14 + $0x434] sm:$0xf]  ;;  %v4058_v14 = vor.u32 %v4524_v7, %v4057_v5  ;;  %v3913_v43 = vld [vmem:[#allocation14 + $0x310] sm:$0xf]  ;;  %v3531_v47 = vld [vmem:[#allocation14 + $0x40] sm:$0xf0] }
 0x461   : > { %v4062_v19 = vor.u32 %v4518_v11, %v4059_v12  ;;  %v4482_v48 = vld [vmem:[#allocation14 + $0x314] sm:$0xf]  ;;  %v3915_v49 = vld [vmem:[#allocation14 + $0x340] sm:$0xf0]  ;;  %v3873_v50 = vld [vmem:[#allocation14 + $0x2b8] sm:$0xf]  ;;  %v3914_v57 = vor.u32 %v4488_v44, %v3913_v43 }
 0x462   : > { %2682 = vmatpush.bf16.msrb.mxu0 %v3522_v18  ;;  %v4009_v18 = vld [vmem:[#allocation14 + $0x3d0] sm:$0xf]  ;;  %v4477_v51 = vld [vmem:[#allocation14 + $0x2e4] sm:$0xf0]  ;;  %v4471_v55 = vld [vmem:[#allocation14 + $0x2bc] sm:$0xf]  ;;  %v3918_v61 = vor.u32 %v4482_v48, %v3915_v49 }
 0x463   : > { %2695 = vmatpush.bf16.msrb.mxu1 %v3906_v10  ;;  %2708 = vmatpush.bf16.msrb.mxu2 %v3526_v22  ;;  %v3627_v10 = vld [vmem:[#allocation14 + $0x100] sm:$0xf0]  ;;  %v4506_v22 = vld [vmem:[#allocation14 + $0x3d4] sm:$0xf]  ;;  %v3875_v56 = vld [vmem:[#allocation14 + $0x2e8] sm:$0xf0]  ;;  %v3874_v62 = vor.u32 %v4477_v51, %v3873_v50 }
 0x464   : > { %2721 = vmatpush.bf16.msrb.mxu3 %v3910_v25  ;;  %v4010_v25 = vor.u32 %v4512_v20, %v4009_v18  ;;  %v4014_v30 = vor.u32 %v4506_v22, %v4011_v23  ;;  %v4567_v59 = vld [vmem:[#allocation14 + $0x5bc] sm:$0xf]  ;;  %v4259_v60 = vld [vmem:[#allocation14 + $0x5e8] sm:$0xf0]  ;;  %v4209_v3 = vld [vmem:[#allocation14 + $0x558] sm:$0xf] }
 0x465   : > { %2683 = vmatmul.bf16.vlgmr.msrb.gmra.mxu0 %v5129_v34  ;;  %v4262_v4 = vor.u32 %v4567_v59, %v4259_v60  ;;  %v4561_v5 = vld [vmem:[#allocation14 + $0x584] sm:$0xf0]  ;;  %v3827_v7 = vld [vmem:[#allocation14 + $0x288] sm:$0xf0]  ;;  %v4555_v8 = vld [vmem:[#allocation14 + $0x55c] sm:$0xf] }
 0x466   : > { %2727 = vmatpush.bf16.msra.mxu0 %v3866_v26  ;;  %2709 = vmatmul.bf16.vlgmr.msrb.gmra.mxu2 %v5129_v34  ;;  %v3630_v26 = vor.u32 %v4410_v21, %v3627_v10  ;;  %v4211_v9 = vld [vmem:[#allocation14 + $0x588] sm:$0xf0]  ;;  %v4210_v12 = vor.u32 %v4561_v5, %v4209_v3  ;;  %v4161_v16 = vld [vmem:[#allocation14 + $0x4f8] sm:$0xf]  ;;  %v4549_v18 = vld [vmem:[#allocation14 + $0x524] sm:$0xf0] }
 0x467   : > { %2740 = vmatpush.bf16.msra.mxu1 %v4250_v27  ;;  %2753 = vmatpush.bf16.msra.mxu2 %v3870_v28  ;;  %v3577_v27 = vld [vmem:[#allocation14 + $0x70] sm:$0xf]  ;;  %v4404_v28 = vld [vmem:[#allocation14 + $0x9c] sm:$0xf0]  ;;  %v4214_v17 = vor.u32 %v4555_v8, %v4211_v9  ;;  %v3779_v20 = vld [vmem:[#allocation14 + $0x228] sm:$0xf0]  ;;  %v4162_v23 = vor.u32 %v4549_v18, %v4161_v16 }
 0x468   : > { %2766 = vmatpush.bf16.msra.mxu3 %v4254_v32  ;;  %2696 = vmatmul.bf16.vlgmr.msrb.gmra.mxu1 %v5131_v35  ;;  %v4398_v32 = vld [vmem:[#allocation14 + $0x74] sm:$0xf]  ;;  %v3578_v38 = vor.u32 %v4404_v28, %v3577_v27  ;;  %v4543_v21 = vld [vmem:[#allocation14 + $0x4fc] sm:$0xf]  ;;  %v4163_v10 = vld [vmem:[#allocation14 + $0x528] sm:$0xf0] }
 0x469   : > { %2722 = vmatmul.bf16.vlgmr.msrb.gmra.mxu3 %v5131_v35  ;;  %v4113_v27 = vld [vmem:[#allocation14 + $0x498] sm:$0xf]  ;;  %v4166_v28 = vor.u32 %v4543_v21, %v4163_v10  ;;  %v4525_v43 = vld [vmem:[#allocation14 + $0x464] sm:$0xf0]  ;;  %v4423_v44 = vld [vmem:[#allocation14 + $0x13c] sm:$0xf] }
 0x46a   : > { %2728 = vmatpush.bf16.msra.mxu0 %v3818_v40  ;;  %v4392_v40 = vld [vmem:[#allocation14 + $0x3c] sm:$0xf0]  ;;  %v3633_v51 = vld [vmem:[#allocation14 + $0xd8] sm:$0xf]  ;;  %v4019_v59 = vld [vmem:[#allocation14 + $0x408] sm:$0xf0] }
 0x46b   : > { %2741 = vmatpush.bf16.msra.mxu1 %v4202_v41  ;;  %2754 = vmatpush.bf16.msra.mxu2 %v3822_v42  ;;  %v3962_v41 = vor.u32 %v4500_v31, %v3961_v29  ;;  %v3582_v42 = vor.u32 %v4398_v32, %v3579_v33  ;;  %v4537_v29 = vld [vmem:[#allocation14 + $0x4c4] sm:$0xf0]  ;;  %v3731_v31 = vld [vmem:[#allocation14 + $0x1c8] sm:$0xf0]  ;;  %v4531_v32 = vld [vmem:[#allocation14 + $0x49c] sm:$0xf] }
 0x46c   : > { %2767 = vmatpush.bf16.msra.mxu3 %v4206_v46  ;;  %v3966_v46 = vor.u32 %v4494_v36, %v3963_v37  ;;  %v4115_v33 = vld [vmem:[#allocation14 + $0x4c8] sm:$0xf0]  ;;  %v4114_v37 = vor.u32 %v4537_v29, %v4113_v27  ;;  %v4501_v3 = vld [vmem:[#allocation14 + $0x3a4] sm:$0xf0]  ;;  %v3537_v9 = vld [vmem:[#allocation14 + $0x18] sm:$0xf] }
 0x46d   : > { %v3587_v5 = vld [vmem:[#allocation14 + $0xa8] sm:$0xf0]  ;;  %v4387_v16 = vld [vmem:[#allocation14 + $0x1c] sm:$0xf]  ;;  %v3881_v21 = vld [vmem:[#allocation14 + $0x2c0] sm:$0xf] }
 0x46e   : > { %2729 = vmatpush.bf16.msra.mxu0 %v3770_v52  ;;  %v4257_v52 = vld [vmem:[#allocation14 + $0x5b8] sm:$0xf]  ;;  %v3539_v18 = vld [vmem:[#allocation14 + $0x48] sm:$0xf0]  ;;  %v4478_v10 = vld [vmem:[#allocation14 + $0x2ec] sm:$0xf0] }
 0x46f   : > { %2742 = vmatpush.bf16.msra.mxu1 %v4154_v53  ;;  %2755 = vmatpush.bf16.msra.mxu2 %v3774_v54  ;;  %v3530_v53 = vor.u32 %v4392_v40, %v3529_v39  ;;  %v4573_v54 = vld [vmem:[#allocation14 + $0x5e4] sm:$0xf0]  ;;  %v3681_v39 = vld [vmem:[#allocation14 + $0x138] sm:$0xf]  ;;  %v4568_v29 = vld [vmem:[#allocation14 + $0x5c4] sm:$0xf] }
 0x470   : > { %2768 = vmatpush.bf16.msra.mxu3 %v4158_v58  ;;  %v3534_v58 = vor.u32 %v4386_v45, %v3531_v47  ;;  %v4258_v63 = vor.u32 %v4573_v54, %v4257_v52  ;;  %v4429_v40 = vld [vmem:[#allocation14 + $0x164] sm:$0xf0]  ;;  %v3683_v45 = vld [vmem:[#allocation14 + $0x168] sm:$0xf0] }
 0x471   : > { %v4067_v47 = vld [vmem:[#allocation14 + $0x468] sm:$0xf0]  ;;  %v3682_v48 = vor.u32 %v4429_v40, %v3681_v39  ;;  %v3686_v50 = vor.u32 %v4423_v44, %v3683_v45  ;;  %v4417_v52 = vld [vmem:[#allocation14 + $0x104] sm:$0xf0]  ;;  %v4217_v39 = vld [vmem:[#allocation14 + $0x560] sm:$0xf] }
 0x472   : > { %2730 = vmatpush.bf16.msra.mxu0 %v3722_v0  ;;  %v3878_v0 = vor.u32 %v4471_v55, %v3875_v56  ;;  %v4513_v55 = vld [vmem:[#allocation14 + $0x404] sm:$0xf0]  ;;  %v4411_v56 = vld [vmem:[#allocation14 + $0xdc] sm:$0xf]  ;;  %v3634_v60 = vor.u32 %v4417_v52, %v3633_v51  ;;  %v4556_v44 = vld [vmem:[#allocation14 + $0x564] sm:$0xf] }
 0x473   : > { %2743 = vmatpush.bf16.msra.mxu1 %v4106_v1  ;;  %2756 = vmatpush.bf16.msra.mxu2 %v3726_v2  ;;  %v3825_v1 = vld [vmem:[#allocation14 + $0x258] sm:$0xf]  ;;  %v4465_v2 = vld [vmem:[#allocation14 + $0x284] sm:$0xf0]  ;;  %v4219_v45 = vld [vmem:[#allocation14 + $0x590] sm:$0xf0] }
 0x474   : > { %2769 = vmatpush.bf16.msra.mxu3 %v4110_v6  ;;  %v4459_v6 = vld [vmem:[#allocation14 + $0x25c] sm:$0xf]  ;;  %v3826_v11 = vor.u32 %v4465_v2, %v3825_v1  ;;  %v3969_v1 = vld [vmem:[#allocation14 + $0x378] sm:$0xf]  ;;  %v4169_v51 = vld [vmem:[#allocation14 + $0x500] sm:$0xf]  ;;  %v4222_v52 = vor.u32 %v4556_v44, %v4219_v45 }
 0x475   : > { %v3545_v45 = vld [vmem:[#allocation14 + $0x20] sm:$0xf] }
 0x476   : > { %2731 = vmatpush.bf16.msra.mxu0 %v3674_v13  ;;  %v3830_v13 = vor.u32 %v4459_v6, %v3827_v7  ;;  %v4495_v6 = vld [vmem:[#allocation14 + $0x37c] sm:$0xf]  ;;  %v3971_v7 = vld [vmem:[#allocation14 + $0x3a8] sm:$0xf0] }
 0x477   : > { %2744 = vmatpush.bf16.msra.mxu1 %v4058_v14  ;;  %2757 = vmatpush.bf16.msra.mxu2 %v3678_v15  ;;  %v3777_v14 = vld [vmem:[#allocation14 + $0x1f8] sm:$0xf]  ;;  %v4453_v15 = vld [vmem:[#allocation14 + $0x224] sm:$0xf0] }
 0x478   : > { %2770 = vmatpush.bf16.msra.mxu3 %v4062_v19  ;;  %v4447_v19 = vld [vmem:[#allocation14 + $0x1fc] sm:$0xf]  ;;  %v3778_v22 = vor.u32 %v4453_v15, %v3777_v14  ;;  %v3921_v14 = vld [vmem:[#allocation14 + $0x318] sm:$0xf]  ;;  %v4489_v15 = vld [vmem:[#allocation14 + $0x344] sm:$0xf0] }
 0x479   : > { %v3922_v27 = vor.u32 %v4489_v15, %v3921_v14  ;;  %v4526_v14 = vld [vmem:[#allocation14 + $0x46c] sm:$0xf0]  ;;  %v4424_v15 = vld [vmem:[#allocation14 + $0x144] sm:$0xf] }
 0x47a   : > { %2732 = vmatpush.bf16.msra.mxu0 %v3626_v24  ;;  %v3782_v24 = vor.u32 %v4447_v19, %v3779_v20  ;;  %v4483_v19 = vld [vmem:[#allocation14 + $0x31c] sm:$0xf]  ;;  %v3923_v20 = vld [vmem:[#allocation14 + $0x348] sm:$0xf0] }
 0x47b   : > { %2745 = vmatpush.bf16.msra.mxu1 %v4010_v25  ;;  %2758 = vmatpush.bf16.msra.mxu2 %v3630_v26  ;;  %v3729_v25 = vld [vmem:[#allocation14 + $0x198] sm:$0xf]  ;;  %v4441_v26 = vld [vmem:[#allocation14 + $0x1c4] sm:$0xf0] }
 0x47c   : > { %2771 = vmatpush.bf16.msra.mxu3 %v4014_v30  ;;  %v4435_v30 = vld [vmem:[#allocation14 + $0x19c] sm:$0xf]  ;;  %v3730_v36 = vor.u32 %v4441_v26, %v3729_v25  ;;  %v4472_v25 = vld [vmem:[#allocation14 + $0x2c4] sm:$0xf]  ;;  %v3883_v26 = vld [vmem:[#allocation14 + $0x2f0] sm:$0xf0] }
 0x47e   : > { %2733 = vmatpush.bf16.msra.mxu0 %v3578_v38  ;;  %v3734_v38 = vor.u32 %v4435_v30, %v3731_v31  ;;  %v4267_v30 = vld [vmem:[#allocation14 + $0x5f0] sm:$0xf0]  ;;  %v3926_v31 = vor.u32 %v4483_v19, %v3923_v20 }
 0x47f   : > { %2746 = vmatpush.bf16.msra.mxu1 %v3962_v41  ;;  %2759 = vmatpush.bf16.msra.mxu2 %v3582_v42  ;;  %v4065_v41 = vld [vmem:[#allocation14 + $0x438] sm:$0xf]  ;;  %v4118_v42 = vor.u32 %v4531_v32, %v4115_v33  ;;  %v3882_v32 = vor.u32 %v4478_v10, %v3881_v21  ;;  %v4270_v40 = vor.u32 %v4568_v29, %v4267_v30  ;;  %v3641_v10 = vld [vmem:[#allocation14 + $0xe0] sm:$0xf]  ;;  %v4027_v29 = vld [vmem:[#allocation14 + $0x410] sm:$0xf0] }
 0x480   : > { %2772 = vmatpush.bf16.msra.mxu3 %v3966_v46  ;;  %v4519_v46 = vld [vmem:[#allocation14 + $0x43c] sm:$0xf]  ;;  %v4066_v49 = vor.u32 %v4525_v43, %v4065_v41  ;;  %v4562_v41 = vld [vmem:[#allocation14 + $0x58c] sm:$0xf0]  ;;  %v3835_v43 = vld [vmem:[#allocation14 + $0x290] sm:$0xf0] }
 0x481   : > { %v4070_v54 = vor.u32 %v4519_v46, %v4067_v47  ;;  %v4218_v47 = vor.u32 %v4562_v41, %v4217_v39  ;;  %v4502_v39 = vld [vmem:[#allocation14 + $0x3ac] sm:$0xf0]  ;;  %v3595_v41 = vld [vmem:[#allocation14 + $0xb0] sm:$0xf0] }
 0x482   : > { %2734 = vmatpush.bf16.msra.mxu0 %v3530_v53  ;;  %v4017_v53 = vld [vmem:[#allocation14 + $0x3d8] sm:$0xf] }
 0x483   : > { %2747 = vmatpush.bf16.msra.mxu1 %v3914_v57  ;;  %2760 = vmatpush.bf16.msra.mxu2 %v3534_v58  ;;  %v3635_v57 = vld [vmem:[#allocation14 + $0x108] sm:$0xf0]  ;;  %v4507_v58 = vld [vmem:[#allocation14 + $0x3dc] sm:$0xf] }
 0x484   : > { %2773 = vmatpush.bf16.msra.mxu3 %v3918_v61  ;;  %v4018_v61 = vor.u32 %v4513_v55, %v4017_v53  ;;  %v4022_v2 = vor.u32 %v4507_v58, %v4019_v59  ;;  %v4550_v53 = vld [vmem:[#allocation14 + $0x52c] sm:$0xf0]  ;;  %v3787_v55 = vld [vmem:[#allocation14 + $0x230] sm:$0xf0] }
 0x485   : > { %2735 = vmatmul.bf16.vlgmr.msra.gmra.mxu0 %v5129_v34  ;;  %v4170_v59 = vor.u32 %v4550_v53, %v4169_v51  ;;  %v4388_v51 = vld [vmem:[#allocation14 + $0x24] sm:$0xf]  ;;  %v3547_v53 = vld [vmem:[#allocation14 + $0x50] sm:$0xf0] }
 0x486   : > { %2779 = vmatpush.bf16.msrb.mxu0 %v3874_v62  ;;  %2761 = vmatmul.bf16.vlgmr.msra.gmra.mxu2 %v5129_v34  ;;  %v3638_v62 = vor.u32 %v4411_v56, %v3635_v57  ;;  %v4544_v56 = vld [vmem:[#allocation14 + $0x504] sm:$0xf]  ;;  %v4171_v57 = vld [vmem:[#allocation14 + $0x530] sm:$0xf0] }
 0x487   : > { %2792 = vmatpush.bf16.msrb.mxu1 %v4258_v63  ;;  %2805 = vmatpush.bf16.msrb.mxu2 %v3878_v0  ;;  %v3585_v63 = vld [vmem:[#allocation14 + $0x78] sm:$0xf]  ;;  %v4405_v0 = vld [vmem:[#allocation14 + $0xa4] sm:$0xf0] }
 0x488   : > { %2818 = vmatpush.bf16.msrb.mxu3 %v4262_v4  ;;  %2748 = vmatmul.bf16.vlgmr.msra.gmra.mxu1 %v5131_v35  ;;  %v4399_v4 = vld [vmem:[#allocation14 + $0x7c] sm:$0xf]  ;;  %v3586_v8 = vor.u32 %v4405_v0, %v3585_v63  ;;  %v4121_v63 = vld [vmem:[#allocation14 + $0x4a0] sm:$0xf]  ;;  %v4174_v0 = vor.u32 %v4544_v56, %v4171_v57  ;;  %v3889_v56 = vld [vmem:[#allocation14 + $0x2c8] sm:$0xf] }
 0x489   : > { %2774 = vmatmul.bf16.vlgmr.msra.gmra.mxu3 %v5131_v35  ;;  %v4479_v57 = vld [vmem:[#allocation14 + $0x2f4] sm:$0xf0] }
 0x48a   : > { %2780 = vmatpush.bf16.msrb.mxu0 %v3826_v11  ;;  %v4393_v11 = vld [vmem:[#allocation14 + $0x44] sm:$0xf0] }
 0x48b   : > { %2793 = vmatpush.bf16.msrb.mxu1 %v4210_v12  ;;  %2806 = vmatpush.bf16.msrb.mxu2 %v3830_v13  ;;  %v3970_v12 = vor.u32 %v4501_v3, %v3969_v1  ;;  %v3590_v13 = vor.u32 %v4399_v4, %v3587_v5  ;;  %v4538_v1 = vld [vmem:[#allocation14 + $0x4cc] sm:$0xf0]  ;;  %v3739_v3 = vld [vmem:[#allocation14 + $0x1d0] sm:$0xf0]  ;;  %v4532_v4 = vld [vmem:[#allocation14 + $0x4a4] sm:$0xf] }
 0x48c   : > { %2819 = vmatpush.bf16.msrb.mxu3 %v4214_v17  ;;  %v3974_v17 = vor.u32 %v4495_v6, %v3971_v7  ;;  %v4123_v5 = vld [vmem:[#allocation14 + $0x4d0] sm:$0xf0]  ;;  %v4122_v7 = vor.u32 %v4538_v1, %v4121_v63  ;;  %v4569_v1 = vld [vmem:[#allocation14 + $0x5cc] sm:$0xf] }
 0x48e   : > { %2781 = vmatpush.bf16.msrb.mxu0 %v3778_v22  ;;  %v4265_v22 = vld [vmem:[#allocation14 + $0x5c0] sm:$0xf] }
 0x48f   : > { %2794 = vmatpush.bf16.msrb.mxu1 %v4162_v23  ;;  %2807 = vmatpush.bf16.msrb.mxu2 %v3782_v24  ;;  %v3538_v23 = vor.u32 %v4393_v11, %v3537_v9  ;;  %v4574_v24 = vld [vmem:[#allocation14 + $0x5ec] sm:$0xf0]  ;;  %v3689_v9 = vld [vmem:[#allocation14 + $0x140] sm:$0xf] }
 0x490   : > { %2820 = vmatpush.bf16.msrb.mxu3 %v4166_v28  ;;  %v3542_v28 = vor.u32 %v4387_v16, %v3539_v18  ;;  %v4266_v33 = vor.u32 %v4574_v24, %v4265_v22  ;;  %v4430_v11 = vld [vmem:[#allocation14 + $0x16c] sm:$0xf0]  ;;  %v3691_v16 = vld [vmem:[#allocation14 + $0x170] sm:$0xf0] }
 0x491   : > { %v4075_v18 = vld [vmem:[#allocation14 + $0x470] sm:$0xf0]  ;;  %v3690_v19 = vor.u32 %v4430_v11, %v3689_v9  ;;  %v3694_v21 = vor.u32 %v4424_v15, %v3691_v16  ;;  %v4418_v22 = vld [vmem:[#allocation14 + $0x10c] sm:$0xf0]  ;;  %v4225_v9 = vld [vmem:[#allocation14 + $0x568] sm:$0xf] }
 0x492   : > { %2782 = vmatpush.bf16.msrb.mxu0 %v3730_v36  ;;  %v3886_v36 = vor.u32 %v4472_v25, %v3883_v26  ;;  %v4514_v25 = vld [vmem:[#allocation14 + $0x40c] sm:$0xf0]  ;;  %v4412_v26 = vld [vmem:[#allocation14 + $0xe4] sm:$0xf]  ;;  %v3642_v30 = vor.u32 %v4418_v22, %v3641_v10  ;;  %v4557_v15 = vld [vmem:[#allocation14 + $0x56c] sm:$0xf] }
 0x493   : > { %2795 = vmatpush.bf16.msrb.mxu1 %v4114_v37  ;;  %2808 = vmatpush.bf16.msrb.mxu2 %v3734_v38  ;;  %v3833_v37 = vld [vmem:[#allocation14 + $0x260] sm:$0xf]  ;;  %v4466_v38 = vld [vmem:[#allocation14 + $0x28c] sm:$0xf0]  ;;  %v4227_v16 = vld [vmem:[#allocation14 + $0x598] sm:$0xf0] }
 0x494   : > { %2821 = vmatpush.bf16.msrb.mxu3 %v4118_v42  ;;  %v4460_v42 = vld [vmem:[#allocation14 + $0x264] sm:$0xf]  ;;  %v3834_v46 = vor.u32 %v4466_v38, %v3833_v37  ;;  %v3977_v37 = vld [vmem:[#allocation14 + $0x380] sm:$0xf]  ;;  %v4177_v10 = vld [vmem:[#allocation14 + $0x508] sm:$0xf]  ;;  %v4230_v22 = vor.u32 %v4557_v15, %v4227_v16 }
 0x495   : > { %v3987_v15 = vld [vmem:[#allocation14 + $0x3b8] sm:$0xf0] }
 0x496   : > { %2783 = vmatpush.bf16.msrb.mxu0 %v3682_v48  ;;  %v3838_v48 = vor.u32 %v4460_v42, %v3835_v43  ;;  %v4496_v42 = vld [vmem:[#allocation14 + $0x384] sm:$0xf]  ;;  %v3979_v43 = vld [vmem:[#allocation14 + $0x3b0] sm:$0xf0] }
 0x497   : > { %2796 = vmatpush.bf16.msrb.mxu1 %v4066_v49  ;;  %2809 = vmatpush.bf16.msrb.mxu2 %v3686_v50  ;;  %v3785_v49 = vld [vmem:[#allocation14 + $0x200] sm:$0xf]  ;;  %v4454_v50 = vld [vmem:[#allocation14 + $0x22c] sm:$0xf0] }
 0x498   : > { %2822 = vmatpush.bf16.msrb.mxu3 %v4070_v54  ;;  %v4448_v54 = vld [vmem:[#allocation14 + $0x204] sm:$0xf]  ;;  %v3786_v58 = vor.u32 %v4454_v50, %v3785_v49  ;;  %v3929_v49 = vld [vmem:[#allocation14 + $0x320] sm:$0xf]  ;;  %v4490_v50 = vld [vmem:[#allocation14 + $0x34c] sm:$0xf0] }
 0x499   : > { %v3930_v63 = vor.u32 %v4490_v50, %v3929_v49  ;;  %v4527_v49 = vld [vmem:[#allocation14 + $0x474] sm:$0xf0]  ;;  %v4425_v50 = vld [vmem:[#allocation14 + $0x14c] sm:$0xf] }
 0x49a   : > { %2784 = vmatpush.bf16.msrb.mxu0 %v3634_v60  ;;  %v3790_v60 = vor.u32 %v4448_v54, %v3787_v55  ;;  %v4484_v54 = vld [vmem:[#allocation14 + $0x324] sm:$0xf]  ;;  %v3931_v55 = vld [vmem:[#allocation14 + $0x350] sm:$0xf0] }
 0x49b   : > { %2797 = vmatpush.bf16.msrb.mxu1 %v4018_v61  ;;  %2810 = vmatpush.bf16.msrb.mxu2 %v3638_v62  ;;  %v3737_v61 = vld [vmem:[#allocation14 + $0x1a0] sm:$0xf]  ;;  %v4442_v62 = vld [vmem:[#allocation14 + $0x1cc] sm:$0xf0] }
 0x49c   : > { %2823 = vmatpush.bf16.msrb.mxu3 %v4022_v2  ;;  %v4436_v2 = vld [vmem:[#allocation14 + $0x1a4] sm:$0xf]  ;;  %v3738_v6 = vor.u32 %v4442_v62, %v3737_v61  ;;  %v4473_v61 = vld [vmem:[#allocation14 + $0x2cc] sm:$0xf]  ;;  %v3891_v62 = vld [vmem:[#allocation14 + $0x2f8] sm:$0xf0] }
 0x49e   : > { %2785 = vmatpush.bf16.msrb.mxu0 %v3586_v8  ;;  %v3742_v8 = vor.u32 %v4436_v2, %v3739_v3  ;;  %v4275_v2 = vld [vmem:[#allocation14 + $0x5f8] sm:$0xf0]  ;;  %v3934_v3 = vor.u32 %v4484_v54, %v3931_v55 }
 0x49f   : > { %2798 = vmatpush.bf16.msrb.mxu1 %v3970_v12  ;;  %2811 = vmatpush.bf16.msrb.mxu2 %v3590_v13  ;;  %v4073_v12 = vld [vmem:[#allocation14 + $0x440] sm:$0xf]  ;;  %v4126_v13 = vor.u32 %v4532_v4, %v4123_v5  ;;  %v3890_v4 = vor.u32 %v4479_v57, %v3889_v56  ;;  %v4278_v11 = vor.u32 %v4569_v1, %v4275_v2  ;;  %v3649_v57 = vld [vmem:[#allocation14 + $0xe8] sm:$0xf]  ;;  %v4035_v1 = vld [vmem:[#allocation14 + $0x418] sm:$0xf0] }
 0x4a0   : > { %2824 = vmatpush.bf16.msrb.mxu3 %v3974_v17  ;;  %v4520_v17 = vld [vmem:[#allocation14 + $0x444] sm:$0xf]  ;;  %v4074_v20 = vor.u32 %v4526_v14, %v4073_v12  ;;  %v4563_v12 = vld [vmem:[#allocation14 + $0x594] sm:$0xf0]  ;;  %v3843_v14 = vld [vmem:[#allocation14 + $0x298] sm:$0xf0] }
 0x4a1   : > { %v4078_v24 = vor.u32 %v4520_v17, %v4075_v18  ;;  %v4226_v18 = vor.u32 %v4563_v12, %v4225_v9  ;;  %v4401_v12 = vld [vmem:[#allocation14 + $0x8c] sm:$0xf] }
 0x4a2   : > { %2786 = vmatpush.bf16.msrb.mxu0 %v3538_v23  ;;  %v4025_v23 = vld [vmem:[#allocation14 + $0x3e0] sm:$0xf] }
 0x4a3   : > { %2799 = vmatpush.bf16.msrb.mxu1 %v3922_v27  ;;  %2812 = vmatpush.bf16.msrb.mxu2 %v3542_v28  ;;  %v3643_v27 = vld [vmem:[#allocation14 + $0x110] sm:$0xf0]  ;;  %v4508_v28 = vld [vmem:[#allocation14 + $0x3e4] sm:$0xf] }
 0x4a4   : > { %2825 = vmatpush.bf16.msrb.mxu3 %v3926_v31  ;;  %v4026_v31 = vor.u32 %v4514_v25, %v4025_v23  ;;  %v4030_v38 = vor.u32 %v4508_v28, %v4027_v29  ;;  %v4551_v23 = vld [vmem:[#allocation14 + $0x534] sm:$0xf0]  ;;  %v3795_v25 = vld [vmem:[#allocation14 + $0x238] sm:$0xf0] }
 0x4a5   : > { %2787 = vmatmul.bf16.vlgmr.msrb.gmra.mxu0 %v5129_v34  ;;  %v4178_v29 = vor.u32 %v4551_v23, %v4177_v10  ;;  %v4395_v10 = vld [vmem:[#allocation14 + $0x54] sm:$0xf0] }
 0x4a6   : > { %2831 = vmatpush.bf16.msra.mxu0 %v3882_v32  ;;  %2813 = vmatmul.bf16.vlgmr.msrb.gmra.mxu2 %v5129_v34  ;;  %v3646_v32 = vor.u32 %v4412_v26, %v3643_v27  ;;  %v4545_v26 = vld [vmem:[#allocation14 + $0x50c] sm:$0xf]  ;;  %v4179_v27 = vld [vmem:[#allocation14 + $0x538] sm:$0xf0] }
 0x4a7   : > { %2844 = vmatpush.bf16.msra.mxu1 %v4266_v33  ;;  %2857 = vmatpush.bf16.msra.mxu2 %v3886_v36  ;;  %v3593_v33 = vld [vmem:[#allocation14 + $0x80] sm:$0xf]  ;;  %v4406_v36 = vld [vmem:[#allocation14 + $0xac] sm:$0xf0] }
 0x4a8   : > { %2870 = vmatpush.bf16.msra.mxu3 %v4270_v40  ;;  %2800 = vmatmul.bf16.vlgmr.msrb.gmra.mxu1 %v5131_v35  ;;  %v4400_v40 = vld [vmem:[#allocation14 + $0x84] sm:$0xf]  ;;  %v3594_v44 = vor.u32 %v4406_v36, %v3593_v33  ;;  %v4129_v33 = vld [vmem:[#allocation14 + $0x4a8] sm:$0xf]  ;;  %v4182_v36 = vor.u32 %v4545_v26, %v4179_v27  ;;  %v3555_v26 = vld [vmem:[#allocation14 + $0x58] sm:$0xf0] }
 0x4a9   : > { %2826 = vmatmul.bf16.vlgmr.msrb.gmra.mxu3 %v5131_v35 }
 0x4aa   : > { %2832 = vmatpush.bf16.msra.mxu0 %v3834_v46  ;;  %v4394_v46 = vld [vmem:[#allocation14 + $0x4c] sm:$0xf0] }
 0x4ab   : > { %2845 = vmatpush.bf16.msra.mxu1 %v4218_v47  ;;  %2858 = vmatpush.bf16.msra.mxu2 %v3838_v48  ;;  %v3978_v47 = vor.u32 %v4502_v39, %v3977_v37  ;;  %v3598_v48 = vor.u32 %v4400_v40, %v3595_v41  ;;  %v4539_v37 = vld [vmem:[#allocation14 + $0x4d4] sm:$0xf0]  ;;  %v3747_v39 = vld [vmem:[#allocation14 + $0x1d8] sm:$0xf0]  ;;  %v4533_v40 = vld [vmem:[#allocation14 + $0x4ac] sm:$0xf] }
 0x4ac   : > { %2871 = vmatpush.bf16.msra.mxu3 %v4222_v52  ;;  %v3982_v52 = vor.u32 %v4496_v42, %v3979_v43  ;;  %v4131_v41 = vld [vmem:[#allocation14 + $0x4d8] sm:$0xf0]  ;;  %v4130_v43 = vor.u32 %v4539_v37, %v4129_v33 }
 0x4ae   : > { %2833 = vmatpush.bf16.msra.mxu0 %v3786_v58  ;;  %v4273_v58 = vld [vmem:[#allocation14 + $0x5c8] sm:$0xf] }
 0x4af   : > { %2846 = vmatpush.bf16.msra.mxu1 %v4170_v59  ;;  %2859 = vmatpush.bf16.msra.mxu2 %v3790_v60  ;;  %v3546_v59 = vor.u32 %v4394_v46, %v3545_v45  ;;  %v4575_v60 = vld [vmem:[#allocation14 + $0x5f4] sm:$0xf0]  ;;  %v3697_v45 = vld [vmem:[#allocation14 + $0x148] sm:$0xf] }
 0x4b0   : > { %2872 = vmatpush.bf16.msra.mxu3 %v4174_v0  ;;  %v3550_v0 = vor.u32 %v4388_v51, %v3547_v53  ;;  %v4274_v5 = vor.u32 %v4575_v60, %v4273_v58  ;;  %v4431_v46 = vld [vmem:[#allocation14 + $0x174] sm:$0xf0]  ;;  %v3699_v51 = vld [vmem:[#allocation14 + $0x178] sm:$0xf0] }
 0x4b1   : > { %v4083_v53 = vld [vmem:[#allocation14 + $0x478] sm:$0xf0]  ;;  %v3698_v54 = vor.u32 %v4431_v46, %v3697_v45  ;;  %v3702_v56 = vor.u32 %v4425_v50, %v3699_v51  ;;  %v4419_v58 = vld [vmem:[#allocation14 + $0x114] sm:$0xf0] }
 0x4b2   : > { %2834 = vmatpush.bf16.msra.mxu0 %v3738_v6  ;;  %v3894_v6 = vor.u32 %v4473_v61, %v3891_v62  ;;  %v4515_v61 = vld [vmem:[#allocation14 + $0x414] sm:$0xf0]  ;;  %v4413_v62 = vld [vmem:[#allocation14 + $0xec] sm:$0xf]  ;;  %v3650_v2 = vor.u32 %v4419_v58, %v3649_v57 }
 0x4b3   : > { %2847 = vmatpush.bf16.msra.mxu1 %v4122_v7  ;;  %2860 = vmatpush.bf16.msra.mxu2 %v3742_v8  ;;  %v3841_v7 = vld [vmem:[#allocation14 + $0x268] sm:$0xf]  ;;  %v4467_v8 = vld [vmem:[#allocation14 + $0x294] sm:$0xf0] }
 0x4b4   : > { %2873 = vmatpush.bf16.msra.mxu3 %v4126_v13  ;;  %v4461_v13 = vld [vmem:[#allocation14 + $0x26c] sm:$0xf]  ;;  %v3842_v17 = vor.u32 %v4467_v8, %v3841_v7  ;;  %v3985_v7 = vld [vmem:[#allocation14 + $0x388] sm:$0xf] }
 0x4b6   : > { %2835 = vmatpush.bf16.msra.mxu0 %v3690_v19  ;;  %v3846_v19 = vor.u32 %v4461_v13, %v3843_v14  ;;  %v3603_v13 = vld [vmem:[#allocation14 + $0xb8] sm:$0xf0]  ;;  %v4497_v14 = vld [vmem:[#allocation14 + $0x38c] sm:$0xf] }
 0x4b7   : > { %2848 = vmatpush.bf16.msra.mxu1 %v4074_v20  ;;  %2861 = vmatpush.bf16.msra.mxu2 %v3694_v21  ;;  %v3793_v20 = vld [vmem:[#allocation14 + $0x208] sm:$0xf]  ;;  %v4455_v21 = vld [vmem:[#allocation14 + $0x234] sm:$0xf0]  ;;  %v3990_v23 = vor.u32 %v4497_v14, %v3987_v15 }
 0x4b8   : > { %2874 = vmatpush.bf16.msra.mxu3 %v4078_v24  ;;  %v4449_v24 = vld [vmem:[#allocation14 + $0x20c] sm:$0xf]  ;;  %v3794_v28 = vor.u32 %v4455_v21, %v3793_v20  ;;  %v3606_v20 = vor.u32 %v4401_v12, %v3603_v13  ;;  %v3553_v21 = vld [vmem:[#allocation14 + $0x28] sm:$0xf] }
 0x4ba   : > { %2836 = vmatpush.bf16.msra.mxu0 %v3642_v30  ;;  %v3798_v30 = vor.u32 %v4449_v24, %v3795_v25  ;;  %v4491_v24 = vld [vmem:[#allocation14 + $0x354] sm:$0xf0]  ;;  %v4389_v25 = vld [vmem:[#allocation14 + $0x2c] sm:$0xf] }
 0x4bb   : > { %2849 = vmatpush.bf16.msra.mxu1 %v4026_v31  ;;  %2862 = vmatpush.bf16.msra.mxu2 %v3646_v32  ;;  %v3745_v31 = vld [vmem:[#allocation14 + $0x1a8] sm:$0xf]  ;;  %v4443_v32 = vld [vmem:[#allocation14 + $0x1d4] sm:$0xf0] }
 0x4bc   : > { %2875 = vmatpush.bf16.msra.mxu3 %v4030_v38  ;;  %v4437_v38 = vld [vmem:[#allocation14 + $0x1ac] sm:$0xf]  ;;  %v3746_v42 = vor.u32 %v4443_v32, %v3745_v31  ;;  %v3554_v32 = vor.u32 %v4395_v10, %v3553_v21 }
 0x4be   : > { %2837 = vmatpush.bf16.msra.mxu0 %v3594_v44  ;;  %v3750_v44 = vor.u32 %v4437_v38, %v3747_v39 }
 0x4bf   : > { %2850 = vmatpush.bf16.msra.mxu1 %v3978_v47  ;;  %2863 = vmatpush.bf16.msra.mxu2 %v3598_v48  ;;  %v4081_v47 = vld [vmem:[#allocation14 + $0x448] sm:$0xf]  ;;  %v4134_v48 = vor.u32 %v4533_v40, %v4131_v41 }
 0x4c0   : > { %2876 = vmatpush.bf16.msra.mxu3 %v3982_v52  ;;  %v4521_v52 = vld [vmem:[#allocation14 + $0x44c] sm:$0xf]  ;;  %v4082_v55 = vor.u32 %v4527_v49, %v4081_v47 }
 0x4c1   : > { %v4086_v60 = vor.u32 %v4521_v52, %v4083_v53 }
 0x4c2   : > { %2838 = vmatpush.bf16.msra.mxu0 %v3546_v59  ;;  %v4033_v59 = vld [vmem:[#allocation14 + $0x3e8] sm:$0xf] }
 0x4c3   : > { %2851 = vmatpush.bf16.msra.mxu1 %v3930_v63  ;;  %2864 = vmatpush.bf16.msra.mxu2 %v3550_v0  ;;  %v3651_v63 = vld [vmem:[#allocation14 + $0x118] sm:$0xf0]  ;;  %v4509_v0 = vld [vmem:[#allocation14 + $0x3ec] sm:$0xf] }
 0x4c4   : > { %2877 = vmatpush.bf16.msra.mxu3 %v3934_v3  ;;  %v4034_v3 = vor.u32 %v4515_v61, %v4033_v59  ;;  %v4038_v9 = vor.u32 %v4509_v0, %v4035_v1 }
 0x4c5   : > { %2839 = vmatmul.bf16.vlgmr.msra.gmra.mxu0 %v5129_v34 }
 0x4c6   : > { %2883 = vmatpush.bf16.msrb.mxu0 %v3890_v4  ;;  %2865 = vmatmul.bf16.vlgmr.msra.gmra.mxu2 %v5129_v34  ;;  %v3654_v4 = vor.u32 %v4413_v62, %v3651_v63  ;;  %v2645_v8 = vpop.f32.mrf.mxu1 }
 0x4c7   : > { %2896 = vmatpush.bf16.msrb.mxu1 %v4274_v5  ;;  %2909 = vmatpush.bf16.msrb.mxu2 %v3894_v6  ;;  %v3601_v5 = vld [vmem:[#allocation14 + $0x88] sm:$0xf]  ;;  %v4407_v6 = vld [vmem:[#allocation14 + $0xb4] sm:$0xf0] }
 0x4c8   : > { %2922 = vmatpush.bf16.msrb.mxu3 %v4278_v11  ;;  %2852 = vmatmul.bf16.vlgmr.msra.gmra.mxu1 %v5131_v35  ;;  %v4503_v11 = vld [vmem:[#allocation14 + $0x3b4] sm:$0xf0] }
 0x4c9   : > { %2878 = vmatmul.bf16.vlgmr.msra.gmra.mxu3 %v5131_v35  ;;  %v2632_v16 = vpop.f32.mrf.mxu0 }
 0x4ca   : > { %2884 = vmatpush.bf16.msrb.mxu0 %v3842_v17  ;;  %v3602_v17 = vor.u32 %v4407_v6, %v3601_v5 }
 0x4cb   : > { %2897 = vmatpush.bf16.msrb.mxu1 %v4226_v18  ;;  %2910 = vmatpush.bf16.msrb.mxu2 %v3846_v19  ;;  %v2646_v18 = vadd.f32 %v2645_v8, %v2632_v16  ;;  %v3986_v19 = vor.u32 %v4503_v11, %v3985_v7  ;;  %v2658_v27 = vpop.f32.mrf.mxu2 }
 0x4cc   : > { %2923 = vmatpush.bf16.msrb.mxu3 %v4230_v22  ;;  %v3937_v22 = vld [vmem:[#allocation14 + $0x328] sm:$0xf] }
 0x4cd   : > { %2935 = vst [vmem:[%s5092_s15] sm:$0xff] %v2646_v18  ;;  %v3938_v33 = vor.u32 %v4491_v24, %v3937_v22 }
 0x4ce   : > { %2885 = vmatpush.bf16.msrb.mxu0 %v3794_v28  ;;  %v2671_v28 = vpop.f32.mrf.mxu3  ;;  %v2647_v37 = vpop.f32.mrf.mxu1 }
 0x4cf   : > { %2898 = vmatpush.bf16.msrb.mxu1 %v4178_v29  ;;  %2911 = vmatpush.bf16.msrb.mxu2 %v3798_v30  ;;  %v4485_v29 = vld [vmem:[#allocation14 + $0x32c] sm:$0xf]  ;;  %v3939_v30 = vld [vmem:[#allocation14 + $0x358] sm:$0xf0]  ;;  %v2672_v31 = vadd.f32 %v2671_v28, %v2658_v27 }
 0x4d0   : > { %2924 = vmatpush.bf16.msrb.mxu3 %v4182_v36  ;;  %v3558_v36 = vor.u32 %v4389_v25, %v3555_v26  ;;  %v3942_v38 = vor.u32 %v4485_v29, %v3939_v30 }
 0x4d1   : > { %2936 = vst [vmem:[%s5092_s15 + $0x8] sm:$0xff] %v2672_v31  ;;  %v2634_v39 = vpop.f32.mrf.mxu0 }
 0x4d2   : > { %2886 = vmatpush.bf16.msrb.mxu0 %v3746_v42 }
 0x4d3   : > { %2899 = vmatpush.bf16.msrb.mxu1 %v4130_v43  ;;  %2912 = vmatpush.bf16.msrb.mxu2 %v3750_v44  ;;  %v2660_v40 = vpop.f32.mrf.mxu2 }
 0x4d4   : > { %2925 = vmatpush.bf16.msrb.mxu3 %v4134_v48 }
 0x4d6   : > { %2887 = vmatpush.bf16.msrb.mxu0 %v3698_v54  ;;  %v2673_v41 = vpop.f32.mrf.mxu3 }
 0x4d7   : > { %2900 = vmatpush.bf16.msrb.mxu1 %v4082_v55  ;;  %2913 = vmatpush.bf16.msrb.mxu2 %v3702_v56 }
 0x4d8   : > { %2926 = vmatpush.bf16.msrb.mxu3 %v4086_v60 }
 0x4da   : > { %2888 = vmatpush.bf16.msrb.mxu0 %v3650_v2 }
 0x4db   : > { %2901 = vmatpush.bf16.msrb.mxu1 %v4034_v3  ;;  %2914 = vmatpush.bf16.msrb.mxu2 %v3654_v4 }
 0x4dc   : > { %2927 = vmatpush.bf16.msrb.mxu3 %v4038_v9 }
 0x4de   : > { %2889 = vmatpush.bf16.msrb.mxu0 %v3602_v17 }
 0x4df   : > { %2902 = vmatpush.bf16.msrb.mxu1 %v3986_v19  ;;  %2915 = vmatpush.bf16.msrb.mxu2 %v3606_v20 }
 0x4e0   : > { %2928 = vmatpush.bf16.msrb.mxu3 %v3990_v23 }
 0x4e2   : > { %2890 = vmatpush.bf16.msrb.mxu0 %v3554_v32  ;;  %v2684_v42 = vpop.f32.mrf.mxu0 }
 0x4e3   : > { %2903 = vmatpush.bf16.msrb.mxu1 %v3938_v33  ;;  %2916 = vmatpush.bf16.msrb.mxu2 %v3558_v36 }
 0x4e4   : > { %2929 = vmatpush.bf16.msrb.mxu3 %v3942_v38 }
 0x4e5   : > { %2891 = vmatmul.bf16.vlgmr.msrb.gmra.mxu0 %v5129_v34  ;;  %v2697_v43 = vpop.f32.mrf.mxu1 }
 0x4e6   : > { %2904 = vmatmul.bf16.vlgmr.msrb.gmra.mxu1 %v5131_v35  ;;  %2917 = vmatmul.bf16.vlgmr.msrb.gmra.mxu2 %v5129_v34  ;;  %v2698_v44 = vadd.f32 %v2697_v43, %v2684_v42 }
 0x4e7   : > { %2930 = vmatmul.bf16.vlgmr.msrb.gmra.mxu3 %v5131_v35 }
 0x4e8   : > { %2937 = vst [vmem:[%s5092_s15 + $0x10] sm:$0xff] %v2698_v44 }
 0x4e9   : > { %v2710_v45 = vpop.f32.mrf.mxu2 }
 0x4ea   : > { %v2686_v48 = vpop.f32.mrf.mxu0 }
 0x4ec   : > { %v2723_v46 = vpop.f32.mrf.mxu3 }
 0x4ed   : > { %v2724_v47 = vadd.f32 %v2723_v46, %v2710_v45  ;;  %v2699_v49 = vpop.f32.mrf.mxu1 }
 0x4ef   : > { %2938 = vst [vmem:[%s5092_s15 + $0x18] sm:$0xff] %v2724_v47 }
 0x4f1   : > { %v2712_v50 = vpop.f32.mrf.mxu2 }
 0x4f4   : > { %v2725_v51 = vpop.f32.mrf.mxu3 }
 0x502   : > { %v2736_v52 = vpop.f32.mrf.mxu0 }
 0x505   : > { %v2749_v53 = vpop.f32.mrf.mxu1 }
 0x506   : > { %v2750_v34 = vadd.f32 %v2749_v53, %v2736_v52 }
 0x508   : > { %2939 = vst [vmem:[%s5092_s15 + $0x20] sm:$0xff] %v2750_v34 }
 0x509   : > { %v2762_v35 = vpop.f32.mrf.mxu2 }
 0x50a   : > { %v2738_v56 = vpop.f32.mrf.mxu0 }
 0x50c   : > { %v2775_v54 = vpop.f32.mrf.mxu3 }
 0x50d   : > { %v2776_v55 = vadd.f32 %v2775_v54, %v2762_v35  ;;  %v2751_v57 = vpop.f32.mrf.mxu1 }
 0x50f   : > { %2940 = vst [vmem:[%s5092_s15 + $0x28] sm:$0xff] %v2776_v55 }
 0x511   : > { %v2764_v58 = vpop.f32.mrf.mxu2 }
 0x514   : > { %v2777_v59 = vpop.f32.mrf.mxu3 }
 0x522   : > { %v2788_v60 = vpop.f32.mrf.mxu0 }
 0x525   : > { %v2801_v61 = vpop.f32.mrf.mxu1 }
 0x526   : > { %v2802_v62 = vadd.f32 %v2801_v61, %v2788_v60 }
 0x528   : > { %2941 = vst [vmem:[%s5092_s15 + $0x30] sm:$0xff] %v2802_v62 }
 0x529   : > { %v2814_v63 = vpop.f32.mrf.mxu2 }
 0x52a   : > { %v2790_v2 = vpop.f32.mrf.mxu0 }
 0x52c   : > { %v2827_v0 = vpop.f32.mrf.mxu3 }
 0x52d   : > { %v2828_v1 = vadd.f32 %v2827_v0, %v2814_v63  ;;  %v2803_v3 = vpop.f32.mrf.mxu1 }
 0x52f   : > { %2942 = vst [vmem:[%s5092_s15 + $0x38] sm:$0xff] %v2828_v1 }
 0x531   : > { %v2816_v4 = vpop.f32.mrf.mxu2 }
 0x534   : > { %v2829_v5 = vpop.f32.mrf.mxu3 }
 0x542   : > { %v2840_v6 = vpop.f32.mrf.mxu0 }
 0x545   : > { %v2853_v7 = vpop.f32.mrf.mxu1 }
 0x546   : > { %v2854_v8 = vadd.f32 %v2853_v7, %v2840_v6 }
 0x548   : > { %2943 = vst [vmem:[%s5092_s15 + $0x40] sm:$0xff] %v2854_v8 }
 0x549   : > { %v2866_v9 = vpop.f32.mrf.mxu2 }
 0x54a   : > { %v2842_v13 = vpop.f32.mrf.mxu0 }
 0x54c   : > { %v2879_v11 = vpop.f32.mrf.mxu3 }
 0x54d   : > { %v2880_v12 = vadd.f32 %v2879_v11, %v2866_v9  ;;  %v2855_v14 = vpop.f32.mrf.mxu1 }
 0x54f   : > { %2944 = vst [vmem:[%s5092_s15 + $0x48] sm:$0xff] %v2880_v12 }
 0x551   : > { %v2868_v15 = vpop.f32.mrf.mxu2 }
 0x554   : > { %v2881_v16 = vpop.f32.mrf.mxu3 }
 0x562   : > { %v2892_v17 = vpop.f32.mrf.mxu0 }
 0x563   : > { %v2905_v18 = vpop.f32.mrf.mxu1 }
 0x564   : > { %v2906_v19 = vadd.f32 %v2905_v18, %v2892_v17 }
 0x566   : > { %2945 = vst [vmem:[%s5092_s15 + $0x50] sm:$0xff] %v2906_v19 }
 0x569   : > { %v2918_v20 = vpop.f32.mrf.mxu2 }
 0x56a   : > { %v2931_v21 = vpop.f32.mrf.mxu3  ;;  %v2894_v10 = vpop.f32.mrf.mxu0 }
 0x56b   : > { %v2932_v22 = vadd.f32 %v2931_v21, %v2918_v20  ;;  %v2907_v23 = vpop.f32.mrf.mxu1 }
 0x56d   : > { %2946 = vst [vmem:[%s5092_s15 + $0x58] sm:$0xff] %v2932_v22 }
 0x571   : > { %v2920_v24 = vpop.f32.mrf.mxu2 }
 0x572   : > { %v2933_v25 = vpop.f32.mrf.mxu3 }
 0x573 PF: > { %s22_s27 = sadd.s32 1, %s4946_s27  }
 0x574   : > { %p19_p8 = scmp.ge.s32.totalorder %s22_s27, 10  }
 0x576   :  { %21 = sbr.rel (!%p19_p8) target bundleno = 4 (0x4), region = 120 }
 0x57b   :  { %2968 = vsyncpa [#allocation5], 1 }
 0x57c   :  { %2970 = vsyncpa [#allocation5 + $0x1], 1 }
 0x57d   :  { %2971 = vsyncpa [#allocation7], 1 }
 0x57e   :  { %2972 = vsyncpa [#allocation10], 1 }
 0x57f   :  { %2973 = vsyncpa [#allocation13], 1 }

</bundles_post_ra>
